<compile_context>
chip_gen: v7x
topology: tpu7x:2x2x1
jax: 0.10.0
libtpu: 0.0.40
codegen_flags: <defaults>
</compile_context>

<pallas_src>
import jax
import jax.numpy as jnp
import numpy as np
from jax.experimental import pallas as pl
from jax.experimental.pallas import tpu as pltpu


# ----------------------------------------------------------------------------
# Pallas kernels
# ----------------------------------------------------------------------------
def _conv_kernel(cols_ref, w_ref, b_ref, out_ref):
    """Pixel-packed im2col conv tile: bf16 x bf16 -> f32 accum, bias + ReLU."""
    y = jnp.dot(cols_ref[...], w_ref[...], preferred_element_type=jnp.float32)
    out_ref[...] = jnp.maximum(y + b_ref[...], 0.0).astype(jnp.bfloat16)


def _mlp_kernel(map_ref, rs_ref, w1m_ref, w1s_ref, b1_ref, w2_ref, b2_ref,
                out_ref):
    """Fused post_fc_stack + logits layer; concat replaced by split weights."""
    # Map branch: bf16 x bf16 -> f32 accumulation (K = HW*OC, lane aligned).
    h = jnp.dot(map_ref[...], w1m_ref[...], preferred_element_type=jnp.float32)
    # Robot-state branch (K = S, tiny): keep it OFF the MXU -- unrolled VPU
    # broadcast-FMAs instead of a second matmul push/drain.
    rs = rs_ref[...]
    w1s = w1s_ref[...]
    for k in range(w1s.shape[0]):          # static unroll, S is small
        h = h + rs[:, k:k + 1] * w1s[k:k + 1, :]
    h = jnp.maximum(h + b1_ref[...], 0.0)
    out_ref[...] = (
        jnp.dot(h, w2_ref[...], preferred_element_type=jnp.float32) + b2_ref[...]
    )


# ----------------------------------------------------------------------------
# Small static helpers
# ----------------------------------------------------------------------------
def _round_up(x, m):
    return ((x + m - 1) // m) * m


def _pack_plan(c, hw):
    """Pick (pack, kpad): pixels packed per matmul row, per-pixel K padding.

    pack*kpad is a multiple of 128 (lane-aligned packed LHS) and pack divides
    HW so the packed output reshapes cleanly back to (B, HW*OC).
    """
    kkc = 9 * c
    for pack in (4, 2, 1):
        if hw % pack == 0:
            return pack, _round_up(kkc, max(128 // pack, 8))
    return 1, _round_up(kkc, 128)


def _row_tile(rows, max_tile):
    """Largest power-of-two tile <= max_tile that divides rows, else full."""
    if rows <= max_tile:
        return rows
    t = max_tile
    while t >= 16:
        if rows % t == 0:
            return t
        t //= 2
    return rows


def _im2col_3x3_same(local_map_nhwc):
    """(B, H, W, C) -> (B, H*W, 9*C) patches, feature order (dy, dx, c)."""
    B, H, W, C = local_map_nhwc.shape
    padded = jnp.pad(local_map_nhwc, ((0, 0), (1, 1), (1, 1), (0, 0)))
    patches = [padded[:, dy:dy + H, dx:dx + W, :]
               for dy in range(3) for dx in range(3)]
    cols = jnp.concatenate(patches, axis=-1)            # (B, H, W, 9*C)
    return cols.reshape(B, H * W, 9 * C)


# ----------------------------------------------------------------------------
# One-time parameter repack
# ----------------------------------------------------------------------------
def prepare_params(params, *, state_size, height, width):
    """Init-time weight repack.

    * Builds the pixel-packed block-diagonal conv weight (lane-dense output)
      and the matching tiled bias, both with per-pixel K zero-padded.
    * Splits W1 into robot-state rows and map rows (kills the runtime concat)
      and permutes the map rows from torch NCHW-flatten order (c*HW + p) to
      the kernel's (p*OC + c) order, so a plain reshape suffices at runtime.
    * Casts the big weights to bf16 (f32 accumulation inside the kernels).
    """
    w_conv = params["w_conv"]                              # (KKC, OC) f32
    kkc, oc = w_conv.shape
    c = kkc // 9
    hw = height * width
    pack, kpad = _pack_plan(c, hw)

    w_pad = jnp.zeros((kpad, oc), jnp.float32).at[:kkc, :].set(w_conv)
    w_blk = jnp.zeros((pack * kpad, pack * oc), jnp.float32)
    for p in range(pack):
        w_blk = w_blk.at[p * kpad:(p + 1) * kpad, p * oc:(p + 1) * oc].set(w_pad)
    w_blk = w_blk.astype(jnp.bfloat16)
    b_blk = jnp.tile(params["b_conv"].reshape(1, oc), (1, pack))   # f32 (1, pack*OC)

    w1 = params["w1"]
    hidden = w1.shape[1]
    w1_state = w1[:state_size]                                     # (S, HIDDEN) f32
    w1_map = (
        w1[state_size:]
        .reshape(oc, hw, hidden)       # rows c-major (torch NCHW flatten)
        .transpose(1, 0, 2)            # -> (p, c, hidden)
        .reshape(hw * oc, hidden)      # rows ordered p*OC + c (kernel order)
        .astype(jnp.bfloat16)
    )
    return {
        "w_blk": w_blk,
        "b_blk": b_blk,
        "w1_state": w1_state,
        "w1_map": w1_map,
        "b1": params["b1"].reshape(1, -1),
        "w2": params["w2"],
        "b2": params["b2"].reshape(1, -1),
    }


# ----------------------------------------------------------------------------
# Forward pass (single jit: two pallas_calls + one order-preserving reshape)
# ----------------------------------------------------------------------------
@jax.jit
def ray_map_encoder_forward(robot_state, local_map, prep):
    """Forward pass of RayMapEncoder (2-tuple obs: robot_state, local_map)."""
    B, H, W, C = local_map.shape
    HW = H * W
    KKC = 9 * C
    pack, kpad = _pack_plan(C, HW)
    w_blk = prep["w_blk"]
    oc = w_blk.shape[1] // pack

    # ---- CNN: bf16 im2col, padded & pixel-packed, one lane-dense matmul -----
    cols = _im2col_3x3_same(local_map.astype(jnp.bfloat16))   # (B, HW, KKC) bf16
    cols = jnp.pad(cols, ((0, 0), (0, 0), (0, kpad - KKC)))
    cols = cols.reshape(B * HW // pack, pack * kpad)

    rows = B * HW // pack
    tr = _row_tile(rows, 1024)
    conv_flops = 2 * rows * (pack * kpad) * (pack * oc)
    conv_bytes = (cols.size * 2 + w_blk.size * 2
                  + prep["b_blk"].size * 4 + rows * pack * oc * 2)
    conv = pl.pallas_call(
        _conv_kernel,
        grid=(rows // tr,),
        in_specs=[
            pl.BlockSpec((tr, pack * kpad), lambda i: (i, 0)),
            pl.BlockSpec((pack * kpad, pack * oc), lambda i: (0, 0)),
            pl.BlockSpec((1, pack * oc), lambda i: (0, 0)),
        ],
        out_specs=pl.BlockSpec((tr, pack * oc), lambda i: (i, 0)),
        out_shape=jax.ShapeDtypeStruct((rows, pack * oc), jnp.bfloat16),
        compiler_params=pltpu.CompilerParams(
            dimension_semantics=("parallel",),
            # Allow XLA to fuse the pad/slice/concat im2col into the kernel's
            # input instead of materializing the 9x-inflated buffer in HBM.
            allow_input_fusion=[True, False, False],
        ),
        cost_estimate=pl.CostEstimate(flops=conv_flops, transcendentals=0,
                                      bytes_accessed=conv_bytes),
    )(cols, w_blk, prep["b_blk"])

    # Order-preserving reshape: packed row r, col (p_local*OC + c) flattens to
    # pixel (pack*r + p_local), channel c  ->  row b, col (p*OC + c).
    # The matching feature order is baked into prep["w1_map"] at init time.
    map_features = conv.reshape(B, HW * oc)

    # ---- post_fc_stack + logits_layer: fused Pallas MLP kernel --------------
    S = robot_state.shape[1]
    K = HW * oc
    hidden = prep["w1_map"].shape[1]
    num_outputs = prep["w2"].shape[1]
    tm = _row_tile(B, 256)
    mlp_flops = 2 * B * (K * hidden + hidden * num_outputs + S * hidden)
    mlp_bytes = (B * K * 2 + prep["w1_map"].size * 2 + B * S * 4
                 + prep["w1_state"].size * 4 + prep["w2"].size * 4
                 + B * num_outputs * 4)
    return pl.pallas_call(
        _mlp_kernel,
        grid=(B // tm,),
        in_specs=[
            pl.BlockSpec((tm, K), lambda i: (i, 0)),
            pl.BlockSpec((tm, S), lambda i: (i, 0)),
            pl.BlockSpec((K, hidden), lambda i: (0, 0)),
            pl.BlockSpec((S, hidden), lambda i: (0, 0)),
            pl.BlockSpec((1, hidden), lambda i: (0, 0)),
            pl.BlockSpec((hidden, num_outputs), lambda i: (0, 0)),
            pl.BlockSpec((1, num_outputs), lambda i: (0, 0)),
        ],
        out_specs=pl.BlockSpec((tm, num_outputs), lambda i: (i, 0)),
        out_shape=jax.ShapeDtypeStruct((B, num_outputs), jnp.float32),
        compiler_params=pltpu.CompilerParams(
            dimension_semantics=("parallel",)),
        cost_estimate=pl.CostEstimate(flops=mlp_flops, transcendentals=0,
                                      bytes_accessed=mlp_bytes),
    )(map_features, robot_state, prep["w1_map"], prep["w1_state"],
      prep["b1"], prep["w2"], prep["b2"])


# ----------------------------------------------------------------------------
# Pure-JAX reference (torch semantics: NCHW flatten + concat), for verification
# ----------------------------------------------------------------------------
def reference_forward(robot_state, local_map, params):
    B, H, W, C = local_map.shape
    OC = params["w_conv"].shape[1]
    cols = _im2col_3x3_same(local_map)                 # (B, HW, KKC) f32
    y = jnp.maximum(
        jnp.einsum("bpk,ko->bpo", cols, params["w_conv"],
                   preferred_element_type=jnp.float32) + params["b_conv"], 0.0)
    feat = y.reshape(B, H, W, OC).transpose(0, 3, 1, 2).reshape(B, -1)  # NCHW
    x = jnp.concatenate([robot_state, feat], axis=-1)
    h = jnp.maximum(x @ params["w1"] + params["b1"], 0.0)
    return h @ params["w2"] + params["b2"]


# ----------------------------------------------------------------------------
# Main
# ----------------------------------------------------------------------------
if __name__ == "__main__":
    # Small shapes consistent with the module:
    #   robot_state: (B, S); local_map obs: (B, H, W, C) with C > 2 -> OC = 32
    B, S = 2, 8
    H, W, C = 16, 16, 4
    OC = 10 if C <= 2 else 32                          # OUT_CHANNELS rule
    KKC = 3 * 3 * C
    HIDDEN = 64                                        # post_fcnet_hiddens=[64]
    NUM_OUTPUTS = 16
    CONCAT = S + OC * H * W

    key = jax.random.PRNGKey(0)
    ks = jax.random.split(key, 8)

    robot_state = jax.random.normal(ks[0], (B, S), dtype=jnp.float32)
    local_map = jax.random.normal(ks[1], (B, H, W, C), dtype=jnp.float32)

    # Parameters in the torch convention (W1 rows: [robot_state | NCHW flatten]).
    params = {
        "w_conv": jax.random.normal(ks[2], (KKC, OC), jnp.float32) / np.sqrt(KKC),
        "b_conv": 0.1 * jax.random.normal(ks[3], (OC,), jnp.float32),
        "w1": jax.random.normal(ks[4], (CONCAT, HIDDEN), jnp.float32) / np.sqrt(CONCAT),
        "b1": 0.1 * jax.random.normal(ks[5], (HIDDEN,), jnp.float32),
        "w2": jax.random.normal(ks[6], (HIDDEN, NUM_OUTPUTS), jnp.float32) / np.sqrt(HIDDEN),
        "b2": 0.1 * jax.random.normal(ks[7], (NUM_OUTPUTS,), jnp.float32),
    }

    # One-time parameter repack (block-diag packed conv weight, split/permuted
    # W1, bf16 casts of the big blocks).
    prep = jax.tree_util.tree_map(jax.block_until_ready,
                                  prepare_params(params, state_size=S,
                                                 height=H, width=W))

    out = ray_map_encoder_forward(robot_state, local_map, prep)
    out = jax.block_until_ready(out)

    ref = jax.block_until_ready(reference_forward(robot_state, local_map, params))

    assert out.shape == (B, NUM_OUTPUTS), out.shape
    # bf16 conv inputs + bf16 map activations/W1 vs f32 reference.
    if not np.allclose(np.asarray(out), np.asarray(ref), rtol=3e-2, atol=3e-2):
        raise AssertionError("Pallas kernel output mismatch vs reference")

    print("KERNEL_OK")
</pallas_src>

<mosaic_0001>
module attributes {stable_mosaic.version = 11 : i64} {
  func.func @_conv_kernel(%arg0: i32, %arg1: memref<128x256xbf16, #tpu.memory_space<vmem>>, %arg2: memref<256x128xbf16, #tpu.memory_space<vmem>>, %arg3: memref<1x128xf32, #tpu.memory_space<vmem>>, %arg4: memref<128x128xbf16, #tpu.memory_space<vmem>>) attributes {dimension_semantics = [#tpu.dimension_semantics<parallel>], iteration_bounds = array<i64: 1>, scalar_prefetch = 0 : i64, scratch_operands = 0 : i64, tpu.core_type = #tpu.core_type<tc>, window_params = [{transform_indices = @transform_0, window_bounds = array<i64: 128, 256>}, {pipeline_mode = #tpu.pipeline_mode<synchronous>, transform_indices = @transform_1, window_bounds = array<i64: 256, 128>}, {pipeline_mode = #tpu.pipeline_mode<synchronous>, transform_indices = @transform_2, window_bounds = array<i64: 1, 128>}, {transform_indices = @transform_3, window_bounds = array<i64: 128, 128>}]} {
    %c0 = arith.constant 0 : index
    %c0_0 = arith.constant 0 : index
    %0 = vector.load %arg1[%c0, %c0_0] : memref<128x256xbf16, #tpu.memory_space<vmem>>, vector<128x256xbf16>
    %c0_1 = arith.constant 0 : index
    %c0_2 = arith.constant 0 : index
    %1 = vector.load %arg2[%c0_1, %c0_2] : memref<256x128xbf16, #tpu.memory_space<vmem>>, vector<256x128xbf16>
    %cst = arith.constant dense<0.000000e+00> : vector<128x128xf32>
    %2 = tpu.matmul %0, %1, %cst {dimension_numbers = #tpu.dot_dimension_numbers<[1], [0], [0], [1], [0, 0, 1, 1], [], []>} : vector<128x256xbf16>, vector<256x128xbf16>, vector<128x128xf32> -> vector<128x128xf32>
    %c0_3 = arith.constant 0 : index
    %c0_4 = arith.constant 0 : index
    %3 = vector.load %arg3[%c0_3, %c0_4] : memref<1x128xf32, #tpu.memory_space<vmem>>, vector<1x128xf32>
    %4 = vector.broadcast %3 : vector<1x128xf32> to vector<128x128xf32>
    %5 = arith.addf %2, %4 : vector<128x128xf32>
    %cst_5 = arith.constant 0.000000e+00 : f32
    %6 = vector.broadcast %cst_5 : f32 to vector<128x128xf32>
    %7 = arith.maximumf %5, %6 : vector<128x128xf32>
    %8 = arith.truncf %7 : vector<128x128xf32> to vector<128x128xbf16>
    %c0_6 = arith.constant 0 : index
    %c0_7 = arith.constant 0 : index
    %9 = vector.load %arg4[%c0_6, %c0_7] : memref<128x128xbf16, #tpu.memory_space<vmem>>, vector<128x128xbf16>
    tpu.vector_store %arg4[%c0_6, %c0_7], %8 {strides = array<i32>} : memref<128x128xbf16, #tpu.memory_space<vmem>>, vector<128x128xbf16>,
    return
  }
  func.func @transform_0(%arg0: i32) -> (i32, i32) {
    %c0_i32 = arith.constant 0 : i32
    %c0_i32_0 = arith.constant 0 : i32
    return %arg0, %c0_i32 : i32, i32
  }
  func.func @transform_1(%arg0: i32) -> (i32, i32) {
    %c0_i32 = arith.constant 0 : i32
    %c0_i32_0 = arith.constant 0 : i32
    %c0_i32_1 = arith.constant 0 : i32
    return %c0_i32, %c0_i32_0 : i32, i32
  }
  func.func @transform_2(%arg0: i32) -> (i32, i32) {
    %c0_i32 = arith.constant 0 : i32
    %c0_i32_0 = arith.constant 0 : i32
    %c0_i32_1 = arith.constant 0 : i32
    return %c0_i32, %c0_i32_0 : i32, i32
  }
  func.func @transform_3(%arg0: i32) -> (i32, i32) {
    %c0_i32 = arith.constant 0 : i32
    %c0_i32_0 = arith.constant 0 : i32
    return %arg0, %c0_i32 : i32, i32
  }
}

module attributes {stable_mosaic.version = 11 : i64} {
  func.func @_mlp_kernel(%arg0: i32, %arg1: memref<2x8192xbf16, #tpu.memory_space<vmem>>, %arg2: memref<2x8xf32, #tpu.memory_space<vmem>>, %arg3: memref<8192x64xbf16, #tpu.memory_space<vmem>>, %arg4: memref<8x64xf32, #tpu.memory_space<vmem>>, %arg5: memref<1x64xf32, #tpu.memory_space<vmem>>, %arg6: memref<64x16xf32, #tpu.memory_space<vmem>>, %arg7: memref<1x16xf32, #tpu.memory_space<vmem>>, %arg8: memref<2x16xf32, #tpu.memory_space<vmem>>) attributes {dimension_semantics = [#tpu.dimension_semantics<parallel>], iteration_bounds = array<i64: 1>, scalar_prefetch = 0 : i64, scratch_operands = 0 : i64, tpu.core_type = #tpu.core_type<tc>, window_params = [{transform_indices = @transform_0, window_bounds = array<i64: 2, 8192>}, {transform_indices = @transform_1, window_bounds = array<i64: 2, 8>}, {pipeline_mode = #tpu.pipeline_mode<synchronous>, transform_indices = @transform_2, window_bounds = array<i64: 8192, 64>}, {pipeline_mode = #tpu.pipeline_mode<synchronous>, transform_indices = @transform_3, window_bounds = array<i64: 8, 64>}, {pipeline_mode = #tpu.pipeline_mode<synchronous>, transform_indices = @transform_4, window_bounds = array<i64: 1, 64>}, {pipeline_mode = #tpu.pipeline_mode<synchronous>, transform_indices = @transform_5, window_bounds = array<i64: 64, 16>}, {pipeline_mode = #tpu.pipeline_mode<synchronous>, transform_indices = @transform_6, window_bounds = array<i64: 1, 16>}, {transform_indices = @transform_7, window_bounds = array<i64: 2, 16>}]} {
    %c0 = arith.constant 0 : index
    %c0_0 = arith.constant 0 : index
    %0 = vector.load %arg1[%c0, %c0_0] : memref<2x8192xbf16, #tpu.memory_space<vmem>>, vector<2x8192xbf16>
    %c0_1 = arith.constant 0 : index
    %c0_2 = arith.constant 0 : index
    %1 = vector.load %arg3[%c0_1, %c0_2] : memref<8192x64xbf16, #tpu.memory_space<vmem>>, vector<8192x64xbf16>
    %cst = arith.constant dense<0.000000e+00> : vector<2x64xf32>
    %2 = tpu.matmul %0, %1, %cst {dimension_numbers = #tpu.dot_dimension_numbers<[1], [0], [0], [1], [0, 0, 1, 1], [], []>} : vector<2x8192xbf16>, vector<8192x64xbf16>, vector<2x64xf32> -> vector<2x64xf32>
    %c0_3 = arith.constant 0 : index
    %c0_4 = arith.constant 0 : index
    %3 = vector.load %arg2[%c0_3, %c0_4] : memref<2x8xf32, #tpu.memory_space<vmem>>, vector<2x8xf32>
    %c0_5 = arith.constant 0 : index
    %c0_6 = arith.constant 0 : index
    %4 = vector.load %arg4[%c0_5, %c0_6] : memref<8x64xf32, #tpu.memory_space<vmem>>, vector<8x64xf32>
    %5 = vector.extract_strided_slice %3 {offsets = [0, 0], sizes = [2, 1], strides = [1, 1]} : vector<2x8xf32> to vector<2x1xf32>
    %6 = vector.extract_strided_slice %4 {offsets = [0, 0], sizes = [1, 64], strides = [1, 1]} : vector<8x64xf32> to vector<1x64xf32>
    %7 = vector.broadcast %5 : vector<2x1xf32> to vector<2x64xf32>
    %8 = vector.broadcast %6 : vector<1x64xf32> to vector<2x64xf32>
    %9 = arith.mulf %7, %8 : vector<2x64xf32>
    %10 = arith.addf %2, %9 : vector<2x64xf32>
    %11 = vector.extract_strided_slice %3 {offsets = [0, 1], sizes = [2, 1], strides = [1, 1]} : vector<2x8xf32> to vector<2x1xf32>
    %12 = vector.extract_strided_slice %4 {offsets = [1, 0], sizes = [1, 64], strides = [1, 1]} : vector<8x64xf32> to vector<1x64xf32>
    %13 = vector.broadcast %11 : vector<2x1xf32> to vector<2x64xf32>
    %14 = vector.broadcast %12 : vector<1x64xf32> to vector<2x64xf32>
    %15 = arith.mulf %13, %14 : vector<2x64xf32>
    %16 = arith.addf %10, %15 : vector<2x64xf32>
    %17 = vector.extract_strided_slice %3 {offsets = [0, 2], sizes = [2, 1], strides = [1, 1]} : vector<2x8xf32> to vector<2x1xf32>
    %18 = vector.extract_strided_slice %4 {offsets = [2, 0], sizes = [1, 64], strides = [1, 1]} : vector<8x64xf32> to vector<1x64xf32>
    %19 = vector.broadcast %17 : vector<2x1xf32> to vector<2x64xf32>
    %20 = vector.broadcast %18 : vector<1x64xf32> to vector<2x64xf32>
    %21 = arith.mulf %19, %20 : vector<2x64xf32>
    %22 = arith.addf %16, %21 : vector<2x64xf32>
    %23 = vector.extract_strided_slice %3 {offsets = [0, 3], sizes = [2, 1], strides = [1, 1]} : vector<2x8xf32> to vector<2x1xf32>
    %24 = vector.extract_strided_slice %4 {offsets = [3, 0], sizes = [1, 64], strides = [1, 1]} : vector<8x64xf32> to vector<1x64xf32>
    %25 = vector.broadcast %23 : vector<2x1xf32> to vector<2x64xf32>
    %26 = vector.broadcast %24 : vector<1x64xf32> to vector<2x64xf32>
    %27 = arith.mulf %25, %26 : vector<2x64xf32>
    %28 = arith.addf %22, %27 : vector<2x64xf32>
    %29 = vector.extract_strided_slice %3 {offsets = [0, 4], sizes = [2, 1], strides = [1, 1]} : vector<2x8xf32> to vector<2x1xf32>
    %30 = vector.extract_strided_slice %4 {offsets = [4, 0], sizes = [1, 64], strides = [1, 1]} : vector<8x64xf32> to vector<1x64xf32>
    %31 = vector.broadcast %29 : vector<2x1xf32> to vector<2x64xf32>
    %32 = vector.broadcast %30 : vector<1x64xf32> to vector<2x64xf32>
    %33 = arith.mulf %31, %32 : vector<2x64xf32>
    %34 = arith.addf %28, %33 : vector<2x64xf32>
    %35 = vector.extract_strided_slice %3 {offsets = [0, 5], sizes = [2, 1], strides = [1, 1]} : vector<2x8xf32> to vector<2x1xf32>
    %36 = vector.extract_strided_slice %4 {offsets = [5, 0], sizes = [1, 64], strides = [1, 1]} : vector<8x64xf32> to vector<1x64xf32>
    %37 = vector.broadcast %35 : vector<2x1xf32> to vector<2x64xf32>
    %38 = vector.broadcast %36 : vector<1x64xf32> to vector<2x64xf32>
    %39 = arith.mulf %37, %38 : vector<2x64xf32>
    %40 = arith.addf %34, %39 : vector<2x64xf32>
    %41 = vector.extract_strided_slice %3 {offsets = [0, 6], sizes = [2, 1], strides = [1, 1]} : vector<2x8xf32> to vector<2x1xf32>
    %42 = vector.extract_strided_slice %4 {offsets = [6, 0], sizes = [1, 64], strides = [1, 1]} : vector<8x64xf32> to vector<1x64xf32>
    %43 = vector.broadcast %41 : vector<2x1xf32> to vector<2x64xf32>
    %44 = vector.broadcast %42 : vector<1x64xf32> to vector<2x64xf32>
    %45 = arith.mulf %43, %44 : vector<2x64xf32>
    %46 = arith.addf %40, %45 : vector<2x64xf32>
    %47 = vector.extract_strided_slice %3 {offsets = [0, 7], sizes = [2, 1], strides = [1, 1]} : vector<2x8xf32> to vector<2x1xf32>
    %48 = vector.extract_strided_slice %4 {offsets = [7, 0], sizes = [1, 64], strides = [1, 1]} : vector<8x64xf32> to vector<1x64xf32>
    %49 = vector.broadcast %47 : vector<2x1xf32> to vector<2x64xf32>
    %50 = vector.broadcast %48 : vector<1x64xf32> to vector<2x64xf32>
    %51 = arith.mulf %49, %50 : vector<2x64xf32>
    %52 = arith.addf %46, %51 : vector<2x64xf32>
    %c0_7 = arith.constant 0 : index
    %c0_8 = arith.constant 0 : index
    %53 = vector.load %arg5[%c0_7, %c0_8] : memref<1x64xf32, #tpu.memory_space<vmem>>, vector<1x64xf32>
    %54 = vector.broadcast %53 : vector<1x64xf32> to vector<2x64xf32>
    %55 = arith.addf %52, %54 : vector<2x64xf32>
    %cst_9 = arith.constant 0.000000e+00 : f32
    %56 = vector.broadcast %cst_9 : f32 to vector<2x64xf32>
    %57 = arith.maximumf %55, %56 : vector<2x64xf32>
    %c0_10 = arith.constant 0 : index
    %c0_11 = arith.constant 0 : index
    %58 = vector.load %arg6[%c0_10, %c0_11] : memref<64x16xf32, #tpu.memory_space<vmem>>, vector<64x16xf32>
    %cst_12 = arith.constant dense<0.000000e+00> : vector<2x16xf32>
    %59 = tpu.matmul %57, %58, %cst_12 {dimension_numbers = #tpu.dot_dimension_numbers<[1], [0], [0], [1], [0, 0, 1, 1], [], []>} : vector<2x64xf32>, vector<64x16xf32>, vector<2x16xf32> -> vector<2x16xf32>
    %c0_13 = arith.constant 0 : index
    %c0_14 = arith.constant 0 : index
    %60 = vector.load %arg7[%c0_13, %c0_14] : memref<1x16xf32, #tpu.memory_space<vmem>>, vector<1x16xf32>
    %61 = vector.broadcast %60 : vector<1x16xf32> to vector<2x16xf32>
    %62 = arith.addf %59, %61 : vector<2x16xf32>
    %c0_15 = arith.constant 0 : index
    %c0_16 = arith.constant 0 : index
    %63 = vector.load %arg8[%c0_15, %c0_16] : memref<2x16xf32, #tpu.memory_space<vmem>>, vector<2x16xf32>
    tpu.vector_store %arg8[%c0_15, %c0_16], %62 {strides = array<i32>} : memref<2x16xf32, #tpu.memory_space<vmem>>, vector<2x16xf32>,
    return
  }
  func.func @transform_0(%arg0: i32) -> (i32, i32) {
    %c0_i32 = arith.constant 0 : i32
    %c0_i32_0 = arith.constant 0 : i32
    return %arg0, %c0_i32 : i32, i32
  }
  func.func @transform_1(%arg0: i32) -> (i32, i32) {
    %c0_i32 = arith.constant 0 : i32
    %c0_i32_0 = arith.constant 0 : i32
    return %arg0, %c0_i32 : i32, i32
  }
  func.func @transform_2(%arg0: i32) -> (i32, i32) {
    %c0_i32 = arith.constant 0 : i32
    %c0_i32_0 = arith.constant 0 : i32
    %c0_i32_1 = arith.constant 0 : i32
    return %c0_i32, %c0_i32_0 : i32, i32
  }
  func.func @transform_3(%arg0: i32) -> (i32, i32) {
    %c0_i32 = arith.constant 0 : i32
    %c0_i32_0 = arith.constant 0 : i32
    %c0_i32_1 = arith.constant 0 : i32
    return %c0_i32, %c0_i32_0 : i32, i32
  }
  func.func @transform_4(%arg0: i32) -> (i32, i32) {
    %c0_i32 = arith.constant 0 : i32
    %c0_i32_0 = arith.constant 0 : i32
    %c0_i32_1 = arith.constant 0 : i32
    return %c0_i32, %c0_i32_0 : i32, i32
  }
  func.func @transform_5(%arg0: i32) -> (i32, i32) {
    %c0_i32 = arith.constant 0 : i32
    %c0_i32_0 = arith.constant 0 : i32
    %c0_i32_1 = arith.constant 0 : i32
    return %c0_i32, %c0_i32_0 : i32, i32
  }
  func.func @transform_6(%arg0: i32) -> (i32, i32) {
    %c0_i32 = arith.constant 0 : i32
    %c0_i32_0 = arith.constant 0 : i32
    %c0_i32_1 = arith.constant 0 : i32
    return %c0_i32, %c0_i32_0 : i32, i32
  }
  func.func @transform_7(%arg0: i32) -> (i32, i32) {
    %c0_i32 = arith.constant 0 : i32
    %c0_i32_0 = arith.constant 0 : i32
    return %arg0, %c0_i32 : i32, i32
  }
}

</mosaic_0001>

<bundles_post_ra>
// kernel: ray_map_encoder_forward.2
= control target key start
LH: loop header
LB: loop body
LE: loop exit
PB: predicated region body
PF: predicated region fallthrough
CT: control target
= control target key end

     0   :  { %s836_s1 = inlined_call_operand.vmem [shape: bf16[256,128], index: 1, kind: input, shape index: {}]   ;;  %s837_s0 = inlined_call_operand.vmem [shape: bf16[128,256], index: 0, kind: input, shape index: {}]   ;;  %s838_s2 = inlined_call_operand.vmem [shape: f32[1,128], index: 2, kind: input, shape index: {}]   ;;  %s839_s3 = inlined_call_operand.vmem [shape: bf16[128,128], index: 3, kind: output, shape index: {}]  }
   0x1   :  { %v635_v0 = vld [vmem:[%s836_s1 + $0x40] sm:$0xff]   ;;  %v637_v2 = vld [vmem:[%s836_s1 + $0x48] sm:$0xff]   ;;  %v639_v4 = vld [vmem:[%s836_s1 + $0x50] sm:$0xff]  }
   0x2   :  { %v636_v1 = vld [vmem:[%s836_s1] sm:$0xff]   ;;  %555 = vmatprep.subr.bf16.mxu0 %v635_v0  ;;  %619 = vmatprep.subr.bf16.mxu1 %v635_v0  ;;  %v638_v3 = vld [vmem:[%s836_s1 + $0x8] sm:$0xff]   ;;  %v640_v5 = vld [vmem:[%s836_s1 + $0x10] sm:$0xff]  }
   0x3   :  { %556 = vmatpush3.bf16.msra.mxu0 %v636_v1  ;;  %627 = vmatpush3.bf16.msra.mxu1 %v636_v1  ;;  %v641_v6 = vld [vmem:[%s836_s1 + $0x58] sm:$0xff]   ;;  %v643_v8 = vld [vmem:[%s836_s1 + $0x60] sm:$0xff]   ;;  %v645_v10 = vld [vmem:[%s836_s1 + $0x68] sm:$0xff]  }
   0x4   :  { %557 = vmatprep.subr.bf16.mxu0 %v637_v2  ;;  %620 = vmatprep.subr.bf16.mxu1 %v637_v2  ;;  %v642_v7 = vld [vmem:[%s836_s1 + $0x18] sm:$0xff]   ;;  %v644_v9 = vld [vmem:[%s836_s1 + $0x20] sm:$0xff]   ;;  %v646_v13 = vld [vmem:[%s836_s1 + $0x28] sm:$0xff]  }
   0x5   :  { %v653_v11 = vld [vmem:[%s837_s0 + $0x4] ss:$8 sps:$4 sm:$0xff]   ;;  %v647_v14 = vld [vmem:[%s836_s1 + $0x70] sm:$0xff]   ;;  %v649_v16 = vld [vmem:[%s836_s1 + $0x78] sm:$0xff]  }
   0x6   :  { %v656_v12 = vld [vmem:[%s837_s0 + $0x44] ss:$8 sps:$4 sm:$0xff]   ;;  %278 = vmatprep.mubr.bf16.mxu0 %v653_v11  ;;  %v648_v15 = vld [vmem:[%s836_s1 + $0x30] sm:$0xff]   ;;  %v650_v17 = vld [vmem:[%s836_s1 + $0x38] sm:$0xff]  }
   0x7   :  { %558 = vmatpush3.bf16.msra.mxu0 %v638_v3  ;;  %628 = vmatpush3.bf16.msra.mxu1 %v638_v3  ;;  %v651_v18 = vld [vmem:[%s837_s0] ss:$8 sps:$4 sm:$0xff]   ;;  %v657_v20 = vld [vmem:[%s837_s0 + $0x14] ss:$8 sps:$4 sm:$0xff]   ;;  %v661_v22 = vld [vmem:[%s837_s0 + $0x10] ss:$8 sps:$4 sm:$0xff]  }
   0x8   :  { %559 = vmatprep.subr.bf16.mxu0 %v639_v4  ;;  %621 = vmatprep.subr.bf16.mxu1 %v639_v4  ;;  %v654_v19 = vld [vmem:[%s837_s0 + $0x40] ss:$8 sps:$4 sm:$0xff]   ;;  %v659_v21 = vld [vmem:[%s837_s0 + $0x54] ss:$8 sps:$4 sm:$0xff]   ;;  %v662_v23 = vld [vmem:[%s837_s0 + $0x50] ss:$8 sps:$4 sm:$0xff]  }
   0x9   :  { %310 = vmatprep.mubr.bf16.mxu1 %v656_v12  ;;  %v663_v24 = vld [vmem:[%s837_s0 + $0x24] ss:$8 sps:$4 sm:$0xff]   ;;  %v667_v26 = vld [vmem:[%s837_s0 + $0x20] ss:$8 sps:$4 sm:$0xff]   ;;  %v669_v28 = vld [vmem:[%s837_s0 + $0x34] ss:$8 sps:$4 sm:$0xff]  }
   0xa   :  { %v665_v25 = vld [vmem:[%s837_s0 + $0x64] ss:$8 sps:$4 sm:$0xff]   ;;  %v668_v27 = vld [vmem:[%s837_s0 + $0x60] ss:$8 sps:$4 sm:$0xff]   ;;  %v671_v29 = vld [vmem:[%s837_s0 + $0x74] ss:$8 sps:$4 sm:$0xff]  }
   0xb   :  { %560 = vmatpush3.bf16.msra.mxu0 %v640_v5  ;;  %629 = vmatpush3.bf16.msra.mxu1 %v640_v5  ;;  %v673_v30 = vld [vmem:[%s837_s0 + $0x30] ss:$8 sps:$4 sm:$0xff]   ;;  %v794_v34 = vld [vmem:[%s838_s2] ss:$0 sm:$0xff] }
   0xc   :  { %561 = vmatprep.subr.bf16.mxu0 %v641_v6  ;;  %622 = vmatprep.subr.bf16.mxu1 %v641_v6  ;;  %v674_v31 = vld [vmem:[%s837_s0 + $0x70] ss:$8 sps:$4 sm:$0xff]  }
   0xf   :  { %562 = vmatpush3.bf16.msra.mxu0 %v642_v7  ;;  %630 = vmatpush3.bf16.msra.mxu1 %v642_v7 }
  0x10   :  { %563 = vmatprep.subr.bf16.mxu0 %v643_v8  ;;  %623 = vmatprep.subr.bf16.mxu1 %v643_v8 }
  0x13   :  { %564 = vmatpush3.bf16.msra.mxu0 %v644_v9  ;;  %631 = vmatpush3.bf16.msra.mxu1 %v644_v9 }
  0x14   :  { %565 = vmatprep.subr.bf16.mxu0 %v645_v10  ;;  %624 = vmatprep.subr.bf16.mxu1 %v645_v10 }
  0x17   :  { %566 = vmatpush3.bf16.msra.mxu0 %v646_v13  ;;  %632 = vmatpush3.bf16.msra.mxu1 %v646_v13 }
  0x18   :  { %567 = vmatprep.subr.bf16.mxu0 %v647_v14  ;;  %625 = vmatprep.subr.bf16.mxu1 %v647_v14 }
  0x1b   :  { %568 = vmatpush3.bf16.msra.mxu0 %v648_v15  ;;  %633 = vmatpush3.bf16.msra.mxu1 %v648_v15 }
  0x1c   :  { %569 = vmatprep.subr.bf16.mxu0 %v649_v16  ;;  %626 = vmatprep.subr.bf16.mxu1 %v649_v16 }
  0x1f   :  { %570 = vmatpush3.bf16.msra.mxu0 %v650_v17  ;;  %634 = vmatpush3.bf16.msra.mxu1 %v650_v17 }
  0x22   :  { %279 = vmatmul.mubr.bf16.vlgmr.msra.gmra.mrb[0].mxu0 %v651_v18  ;;  %311 = vmatmul.mubr.bf16.vlgmr.msra.gmra.mrb[0].mxu1 %v654_v19 }
  0x23   :  { %286 = vmatprep.mubr.bf16.mxu0 %v657_v20  ;;  %318 = vmatprep.mubr.bf16.mxu1 %v659_v21 }
  0x2a   :  { %287 = vmatmul.mubr.bf16.gmra.mrb[4].mxu0 %v661_v22  ;;  %319 = vmatmul.mubr.bf16.gmra.mrb[4].mxu1 %v662_v23 }
  0x2b   :  { %294 = vmatprep.mubr.bf16.mxu0 %v663_v24  ;;  %326 = vmatprep.mubr.bf16.mxu1 %v665_v25 }
  0x32   :  { %295 = vmatmul.mubr.bf16.gmra.mrb[8].mxu0 %v667_v26  ;;  %327 = vmatmul.mubr.bf16.gmra.mrb[8].mxu1 %v668_v27 }
  0x33   :  { %302 = vmatprep.mubr.bf16.mxu0 %v669_v28  ;;  %334 = vmatprep.mubr.bf16.mxu1 %v671_v29 }
  0x3a   :  { %303 = vmatmul.mubr.bf16.gmra.mrb[12].mxu0 %v673_v30  ;;  %335 = vmatmul.mubr.bf16.gmra.mrb[12].mxu1 %v674_v31 }
  0xf5   :  { %v571_v32 = vpop.f32.mrb[0].mxu0  ;;  %v595_v33 = vpop.f32.mrb[0].mxu1 }
  0xf6   :  { %v572_v35 = vpop.f32.mrb[1].mxu0  ;;  %v596_v36 = vpop.f32.mrb[1].mxu1 }
  0xf7   :  { %v573_v37 = vadd.f32 %v572_v35, %v571_v32  ;;  %v597_v38 = vadd.f32 %v596_v36, %v595_v33  ;;  %v574_v39 = vpop.f32.mrb[2].mxu0  ;;  %v598_v40 = vpop.f32.mrb[2].mxu1 }
  0xf8   :  { %v575_v41 = vpop.f32.mrb[3].mxu0  ;;  %v599_v42 = vpop.f32.mrb[3].mxu1 }
  0xf9   :  { %v281_v43 = vadd.f32 %v573_v37, %v794_v34  ;;  %v313_v44 = vadd.f32 %v597_v38, %v794_v34  ;;  %v576_v45 = vadd.f32 %v575_v41, %v574_v39  ;;  %v600_v46 = vadd.f32 %v599_v42, %v598_v40 }
  0xfb   :  { %v284_v47 = vadd.f32 %v576_v45, %v794_v34  ;;  %v316_v48 = vadd.f32 %v600_v46, %v794_v34  ;;  %v343_v49 = vmax.f32 %v281_v43, 0.0  ;;  %v351_v50 = vmax.f32 %v313_v44, 0.0 }
  0xfd   :  { %v344_v51 = vmax.f32 %v284_v47, 0.0  ;;  %v352_v52 = vmax.f32 %v316_v48, 0.0  ;;  %v577_v53 = vpop.f32.mrb[4].mxu0  ;;  %v601_v54 = vpop.f32.mrb[4].mxu1 }
  0xfe   :  { %v578_v55 = vpop.f32.mrb[5].mxu0  ;;  %v602_v56 = vpop.f32.mrb[5].mxu1 }
  0xff   :  { %v511_v57 = vpack.c.bf16 %v344_v51, %v343_v49  ;;  %v531_v58 = vpack.c.bf16 %v352_v52, %v351_v50  ;;  %v579_v59 = vadd.f32 %v578_v55, %v577_v53  ;;  %v603_v60 = vadd.f32 %v602_v56, %v601_v54  ;;  %v580_v61 = vpop.f32.mrb[6].mxu0  ;;  %v604_v62 = vpop.f32.mrb[6].mxu1 }
 0x100   :  { %v581_v63 = vpop.f32.mrb[7].mxu0  ;;  %v605_v0 = vpop.f32.mrb[7].mxu1 }
 0x101   :  { %512 = vst [vmem:[%s839_s3] sm:$0xff] %v511_v57   ;;  %551 = vst [vmem:[%s839_s3 + $0x20] sm:$0xff] %v531_v58   ;;  %v289_v1 = vadd.f32 %v579_v59, %v794_v34  ;;  %v321_v2 = vadd.f32 %v603_v60, %v794_v34  ;;  %v582_v3 = vadd.f32 %v581_v63, %v580_v61 }
 0x102   :  { %v606_v4 = vadd.f32 %v605_v0, %v604_v62 }
 0x103   :  { %v292_v5 = vadd.f32 %v582_v3, %v794_v34  ;;  %v345_v7 = vmax.f32 %v289_v1, 0.0  ;;  %v353_v8 = vmax.f32 %v321_v2, 0.0 }
 0x104   :  { %v324_v6 = vadd.f32 %v606_v4, %v794_v34 }
 0x105   :  { %v346_v9 = vmax.f32 %v292_v5, 0.0  ;;  %v583_v11 = vpop.f32.mrb[8].mxu0  ;;  %v607_v12 = vpop.f32.mrb[8].mxu1 }
 0x106   :  { %v354_v10 = vmax.f32 %v324_v6, 0.0  ;;  %v584_v13 = vpop.f32.mrb[9].mxu0  ;;  %v608_v14 = vpop.f32.mrb[9].mxu1 }
 0x107   :  { %v516_v15 = vpack.c.bf16 %v346_v9, %v345_v7  ;;  %v585_v17 = vadd.f32 %v584_v13, %v583_v11  ;;  %v609_v18 = vadd.f32 %v608_v14, %v607_v12  ;;  %v586_v19 = vpop.f32.mrb[10].mxu0  ;;  %v610_v20 = vpop.f32.mrb[10].mxu1 }
 0x108   :  { %v536_v16 = vpack.c.bf16 %v354_v10, %v353_v8  ;;  %v587_v21 = vpop.f32.mrb[11].mxu0  ;;  %v611_v22 = vpop.f32.mrb[11].mxu1 }
 0x109   :  { %548 = vst [vmem:[%s839_s3 + $0x8] sm:$0xff] %v516_v15   ;;  %v297_v23 = vadd.f32 %v585_v17, %v794_v34  ;;  %v329_v24 = vadd.f32 %v609_v18, %v794_v34  ;;  %v588_v25 = vadd.f32 %v587_v21, %v586_v19  ;;  %v612_v26 = vadd.f32 %v611_v22, %v610_v20 }
 0x10a   :  { %552 = vst [vmem:[%s839_s3 + $0x28] sm:$0xff] %v536_v16  }
 0x10b   :  { %v300_v27 = vadd.f32 %v588_v25, %v794_v34  ;;  %v332_v28 = vadd.f32 %v612_v26, %v794_v34  ;;  %v347_v29 = vmax.f32 %v297_v23, 0.0  ;;  %v355_v30 = vmax.f32 %v329_v24, 0.0 }
 0x10d   :  { %v348_v31 = vmax.f32 %v300_v27, 0.0  ;;  %v356_v32 = vmax.f32 %v332_v28, 0.0  ;;  %v589_v33 = vpop.f32.mrb[12].mxu0  ;;  %v613_v35 = vpop.f32.mrb[12].mxu1 }
 0x10e   :  { %v590_v36 = vpop.f32.mrb[13].mxu0  ;;  %v614_v37 = vpop.f32.mrb[13].mxu1 }
 0x10f   :  { %v521_v38 = vpack.c.bf16 %v348_v31, %v347_v29  ;;  %v541_v39 = vpack.c.bf16 %v356_v32, %v355_v30  ;;  %v591_v40 = vadd.f32 %v590_v36, %v589_v33  ;;  %v615_v41 = vadd.f32 %v614_v37, %v613_v35  ;;  %v592_v42 = vpop.f32.mrb[14].mxu0  ;;  %v616_v43 = vpop.f32.mrb[14].mxu1 }
 0x110   :  { %v593_v44 = vpop.f32.mrb[15].mxu0  ;;  %v617_v45 = vpop.f32.mrb[15].mxu1 }
 0x111   :  { %549 = vst [vmem:[%s839_s3 + $0x10] sm:$0xff] %v521_v38   ;;  %553 = vst [vmem:[%s839_s3 + $0x30] sm:$0xff] %v541_v39   ;;  %v305_v46 = vadd.f32 %v591_v40, %v794_v34  ;;  %v337_v47 = vadd.f32 %v615_v41, %v794_v34  ;;  %v594_v48 = vadd.f32 %v593_v44, %v592_v42 }
 0x112   :  { %v618_v49 = vadd.f32 %v617_v45, %v616_v43 }
 0x113   :  { %v308_v50 = vadd.f32 %v594_v48, %v794_v34  ;;  %v349_v52 = vmax.f32 %v305_v46, 0.0  ;;  %v357_v53 = vmax.f32 %v337_v47, 0.0 }
 0x114   :  { %v340_v51 = vadd.f32 %v618_v49, %v794_v34 }
 0x115   :  { %v350_v54 = vmax.f32 %v308_v50, 0.0 }
 0x116   :  { %v358_v55 = vmax.f32 %v340_v51, 0.0 }
 0x117   :  { %v526_v56 = vpack.c.bf16 %v350_v54, %v349_v52 }
 0x118   :  { %v546_v57 = vpack.c.bf16 %v358_v55, %v357_v53 }
 0x119   :  { %550 = vst [vmem:[%s839_s3 + $0x18] sm:$0xff] %v526_v56  }
 0x11a   :  { %554 = vst [vmem:[%s839_s3 + $0x38] sm:$0xff] %v546_v57  }

// kernel: ray_map_encoder_forward.3
= control target key start
LH: loop header
LB: loop body
LE: loop exit
PB: predicated region body
PF: predicated region fallthrough
CT: control target
= control target key end

     0   :  { %v7899_v3 = vmov 0   ;;  %v1067_v29 = vlaneseq  ;;  %v7900_v37 = vmov 1966171168   ;;  %s9700_s0 = inlined_call_operand.vmem [shape: bf16[2,8192], index: 0, kind: input, shape index: {}]   ;;  %s9701_s1 = inlined_call_operand.vmem [shape: f32[2,8], index: 1, kind: input, shape index: {}]   ;;  %s9702_s2 = inlined_call_operand.vmem [shape: bf16[8192,64], index: 2, kind: input, shape index: {}]   ;;  %s9703_s3 = inlined_call_operand.vmem [shape: f32[8,64], index: 3, kind: input, shape index: {}]   ;;  %s9704_s4 = inlined_call_operand.vmem [shape: f32[1,64], index: 4, kind: input, shape index: {}]   ;;  %s9705_s5 = inlined_call_operand.vmem [shape: f32[64,16], index: 5, kind: input, shape index: {}]   ;;  %s9706_s6 = inlined_call_operand.vmem [shape: f32[1,16], index: 6, kind: input, shape index: {}]   ;;  %s9707_s7 = inlined_call_operand.hbm [shape: f32[2,16], index: 7, kind: output, shape index: {}]  }
   0x1   :  { %v7353_v0 = vld [vmem:[%s9702_s2 + $0x40] sm:$0xff]   ;;  %7344 = vset.pattern.permute.xlu0 %v7899_v3  ;;  %v7357_v5 = vld [vmem:[%s9702_s2 + $0x48] sm:$0xff]   ;;  %v7361_v9 = vld [vmem:[%s9702_s2 + $0x50] sm:$0xff]   ;;  %v1082_v38 = vunpack.c.l.s4 %v7900_v37 }
   0x2   :  { %v7354_v1 = vld [vmem:[%s9702_s2 + $0xc0] sm:$0xff]   ;;  %6587 = vmatprep.subr.bf16.mxu0 %v7353_v0  ;;  %v7358_v6 = vld [vmem:[%s9702_s2 + $0xc8] sm:$0xff]   ;;  %v7362_v10 = vld [vmem:[%s9702_s2 + $0xd0] sm:$0xff]   ;;  %v8048_v34 = vshrl.u32 %v1067_v29, 7 }
   0x3   :  { %v7355_v2 = vld [vmem:[%s9702_s2] sm:$0xff]   ;;  %6609 = vmatprep.subr.bf16.mxu1 %v7354_v1  ;;  %v7359_v7 = vld [vmem:[%s9702_s2 + $0x8] sm:$0xff]   ;;  %v7363_v11 = vld [vmem:[%s9702_s2 + $0x10] sm:$0xff]   ;;  %v1083_v41 = vunpack.c.0.s8 %v1082_v38 }
   0x4   :  { %v7356_v4 = vld [vmem:[%s9702_s2 + $0x80] sm:$0xff]   ;;  %6588 = vmatpush3.bf16.msra.mxu0 %v7355_v2  ;;  %v7360_v8 = vld [vmem:[%s9702_s2 + $0x88] sm:$0xff]   ;;  %v7364_v12 = vld [vmem:[%s9702_s2 + $0x90] sm:$0xff]  }
   0x5   :  { %6610 = vmatpush3.bf16.msra.mxu1 %v7356_v4  ;;  %6589 = vmatprep.subr.bf16.mxu0 %v7357_v5  ;;  %v7365_v13 = vld [vmem:[%s9702_s2 + $0x58] sm:$0xff]   ;;  %v7369_v17 = vld [vmem:[%s9702_s2 + $0x60] sm:$0xff]   ;;  %v7373_v21 = vld [vmem:[%s9702_s2 + $0x68] sm:$0xff]   ;;  %v8060_v42 = vsub.s32 %v1083_v41, %v8048_v34 }
   0x6   :  { %6611 = vmatprep.subr.bf16.mxu1 %v7358_v6  ;;  %v7366_v14 = vld [vmem:[%s9702_s2 + $0xd8] sm:$0xff]   ;;  %v7370_v18 = vld [vmem:[%s9702_s2 + $0xe0] sm:$0xff]   ;;  %v7374_v22 = vld [vmem:[%s9702_s2 + $0xe8] sm:$0xff]  }
   0x7   :  { %v7367_v15 = vld [vmem:[%s9702_s2 + $0x18] sm:$0xff]   ;;  %v7371_v19 = vld [vmem:[%s9702_s2 + $0x20] sm:$0xff]   ;;  %v7375_v23 = vld [vmem:[%s9702_s2 + $0x28] sm:$0xff]  }
   0x8   :  { %6590 = vmatpush3.bf16.msra.mxu0 %v7359_v7  ;;  %v7368_v16 = vld [vmem:[%s9702_s2 + $0x98] sm:$0xff]   ;;  %v7372_v20 = vld [vmem:[%s9702_s2 + $0xa0] sm:$0xff]   ;;  %v7376_v24 = vld [vmem:[%s9702_s2 + $0xa8] sm:$0xff]  }
   0x9   :  { %6612 = vmatpush3.bf16.msra.mxu1 %v7360_v8  ;;  %6591 = vmatprep.subr.bf16.mxu0 %v7361_v9  ;;  %v7377_v25 = vld [vmem:[%s9702_s2 + $0x70] sm:$0xff]   ;;  %v7381_v30 = vld [vmem:[%s9702_s2 + $0x78] sm:$0xff]   ;;  %v28_v35 = vld [vmem:[%s9700_s0] sm:$0xff] }
   0xa   :  { %6613 = vmatprep.subr.bf16.mxu1 %v7362_v10  ;;  %v7378_v26 = vld [vmem:[%s9702_s2 + $0xf0] sm:$0xff]   ;;  %v7382_v31 = vld [vmem:[%s9702_s2 + $0xf8] sm:$0xff]   ;;  %v7386_v36 = vld [vmem:[%s9702_s2 + $0x140] sm:$0xff]   ;;  %v1080_v40 = vcombine.high %v28_v35, %v28_v35  ;;  %v1087_v43 = vrot.slane %v28_v35, %v8060_v42 }
   0xb   :  { %v7379_v27 = vld [vmem:[%s9702_s2 + $0x30] sm:$0xff]   ;;  %v7383_v32 = vld [vmem:[%s9702_s2 + $0x38] sm:$0xff]   ;;  %v7387_v39 = vld [vmem:[%s9702_s2 + $0x1c0] sm:$0xff]  }
   0xc   :  { %6592 = vmatpush3.bf16.msra.mxu0 %v7363_v11  ;;  %v7380_v28 = vld [vmem:[%s9702_s2 + $0xb0] sm:$0xff]   ;;  %v7384_v33 = vld [vmem:[%s9702_s2 + $0xb8] sm:$0xff]   ;;  %v8064_v44 = vrot.slane %v1080_v40, %v8060_v42  ;;  %v1095_v45 = vcombine.high %v1087_v43, %v1087_v43  ;;  %v1103_v46 = vrot.slane %v1087_v43, %v8060_v42  ;;  %v7388_v48 = vld [vmem:[%s9702_s2 + $0x100] sm:$0xff]  }
   0xd   :  { %6614 = vmatpush3.bf16.msra.mxu1 %v7364_v12  ;;  %6593 = vmatprep.subr.bf16.mxu0 %v7365_v13  ;;  %v7389_v50 = vld [vmem:[%s9702_s2 + $0x180] sm:$0xff]   ;;  %v7390_v53 = vld [vmem:[%s9702_s2 + $0x148] sm:$0xff]   ;;  %v7394_v59 = vld [vmem:[%s9702_s2 + $0x150] sm:$0xff]  }
   0xe   :  { %6615 = vmatprep.subr.bf16.mxu1 %v7366_v14  ;;  %v1096_v47 = vcombine.high %v8064_v44, %v8064_v44  ;;  %v1117_v49 = vrot.slane %v1095_v45, %v8060_v42  ;;  %v1125_v52 = vcombine.high %v1103_v46, %v1103_v46  ;;  %v7391_v55 = vld [vmem:[%s9702_s2 + $0x1c8] sm:$0xff]   ;;  %v7395_v60 = vld [vmem:[%s9702_s2 + $0x1d0] sm:$0xff]   ;;  %v7398_v63 = vld [vmem:[%s9702_s2 + $0x158] sm:$0xff]  }
   0xf   :  { %v7392_v56 = vld [vmem:[%s9702_s2 + $0x108] sm:$0xff]   ;;  %v7396_v61 = vld [vmem:[%s9702_s2 + $0x110] sm:$0xff]   ;;  %v7399_v0 = vld [vmem:[%s9702_s2 + $0x1d8] sm:$0xff]  }
  0x10   :  { %6594 = vmatpush3.bf16.msra.mxu0 %v7367_v15  ;;  %v1124_v51 = vrot.slane %v1096_v47, %v8060_v42  ;;  %4640 = vmatprep.mubr.bf16.mxu0 %v1117_v49  ;;  %v1127_v54 = vcombine.high %v1117_v49, %v1117_v49  ;;  %v7393_v58 = vld [vmem:[%s9702_s2 + $0x188] sm:$0xff]   ;;  %v7397_v62 = vld [vmem:[%s9702_s2 + $0x190] sm:$0xff]   ;;  %v7400_v1 = vld [vmem:[%s9702_s2 + $0x118] sm:$0xff]  }
  0x11   :  { %6616 = vmatpush3.bf16.msra.mxu1 %v7368_v16  ;;  %6595 = vmatprep.subr.bf16.mxu0 %v7369_v17  ;;  %v7401_v2 = vld [vmem:[%s9702_s2 + $0x198] sm:$0xff]   ;;  %v7402_v3 = vld [vmem:[%s9702_s2 + $0x160] sm:$0xff]   ;;  %v7406_v7 = vld [vmem:[%s9702_s2 + $0x168] sm:$0xff]  }
  0x12   :  { %6617 = vmatprep.subr.bf16.mxu1 %v7370_v18  ;;  %v1128_v57 = vcombine.high %v1124_v51, %v1124_v51  ;;  %4680 = vmatprep.mubr.bf16.mxu1 %v1127_v54  ;;  %v7403_v4 = vld [vmem:[%s9702_s2 + $0x1e0] sm:$0xff]   ;;  %v7407_v8 = vld [vmem:[%s9702_s2 + $0x1e8] sm:$0xff]   ;;  %v7410_v11 = vld [vmem:[%s9702_s2 + $0x170] sm:$0xff]  }
  0x13   :  { %v7404_v5 = vld [vmem:[%s9702_s2 + $0x120] sm:$0xff]   ;;  %v7408_v9 = vld [vmem:[%s9702_s2 + $0x128] sm:$0xff]   ;;  %v7411_v12 = vld [vmem:[%s9702_s2 + $0x1f0] sm:$0xff]  }
  0x14   :  { %6596 = vmatpush3.bf16.msra.mxu0 %v7371_v19  ;;  %v7405_v6 = vld [vmem:[%s9702_s2 + $0x1a0] sm:$0xff]   ;;  %v7409_v10 = vld [vmem:[%s9702_s2 + $0x1a8] sm:$0xff]   ;;  %v7412_v13 = vld [vmem:[%s9702_s2 + $0x130] sm:$0xff]   ;;  %v1110_v19 = vrot.slane %v8064_v44, %v8060_v42 }
  0x15   :  { %6618 = vmatpush3.bf16.msra.mxu1 %v7372_v20  ;;  %6597 = vmatprep.subr.bf16.mxu0 %v7373_v21  ;;  %v7413_v14 = vld [vmem:[%s9702_s2 + $0x1b0] sm:$0xff]   ;;  %v7414_v15 = vld [vmem:[%s9702_s2 + $0x178] sm:$0xff]   ;;  %v7418_v20 = vld [vmem:[%s9702_s2 + $0x240] sm:$0xff]  }
  0x16   :  { %6619 = vmatprep.subr.bf16.mxu1 %v7374_v22  ;;  %v7415_v16 = vld [vmem:[%s9702_s2 + $0x1f8] sm:$0xff]   ;;  %v7419_v21 = vld [vmem:[%s9702_s2 + $0x2c0] sm:$0xff]   ;;  %v7426_v29 = vld [vmem:[%s9702_s2 + $0x250] sm:$0xff]  }
  0x17   :  { %v7416_v17 = vld [vmem:[%s9702_s2 + $0x138] sm:$0xff]   ;;  %v7420_v22 = vld [vmem:[%s9702_s2 + $0x200] sm:$0xff]   ;;  %v7438_v43 = vld [vmem:[%s9702_s2 + $0x268] sm:$0xff]  }
  0x18   :  { %6598 = vmatpush3.bf16.msra.mxu0 %v7375_v23  ;;  %v7417_v18 = vld [vmem:[%s9702_s2 + $0x1b8] sm:$0xff]   ;;  %v7421_v23 = vld [vmem:[%s9702_s2 + $0x280] sm:$0xff]   ;;  %v7439_v44 = vld [vmem:[%s9702_s2 + $0x2e8] sm:$0xff]  }
  0x19   :  { %6620 = vmatpush3.bf16.msra.mxu1 %v7376_v24  ;;  %6599 = vmatprep.subr.bf16.mxu0 %v7377_v25  ;;  %v1126_v24 = vcombine.high %v1110_v19, %v1110_v19  ;;  %v7422_v25 = vld [vmem:[%s9702_s2 + $0x248] sm:$0xff]   ;;  %v7431_v35 = vld [vmem:[%s9702_s2 + $0x2d8] sm:$0xff]   ;;  %v7434_v38 = vld [vmem:[%s9702_s2 + $0x260] sm:$0xff]  }
  0x1a   :  { %6621 = vmatprep.subr.bf16.mxu1 %v7378_v26  ;;  %v7423_v26 = vld [vmem:[%s9702_s2 + $0x2c8] sm:$0xff]   ;;  %v7433_v37 = vld [vmem:[%s9702_s2 + $0x298] sm:$0xff]   ;;  %v7436_v40 = vld [vmem:[%s9702_s2 + $0x220] sm:$0xff]  }
  0x1b   :  { %v7437_v41 = vld [vmem:[%s9702_s2 + $0x2a0] sm:$0xff]   ;;  %v7440_v45 = vld [vmem:[%s9702_s2 + $0x228] sm:$0xff]   ;;  %v7442_v47 = vld [vmem:[%s9702_s2 + $0x270] sm:$0xff]  }
  0x1c   :  { %6600 = vmatpush3.bf16.msra.mxu0 %v7379_v27  ;;  %v7424_v27 = vld [vmem:[%s9702_s2 + $0x208] sm:$0xff]   ;;  %v7443_v49 = vld [vmem:[%s9702_s2 + $0x2f0] sm:$0xff]  }
  0x1d   :  { %6622 = vmatpush3.bf16.msra.mxu1 %v7380_v28  ;;  %6601 = vmatprep.subr.bf16.mxu0 %v7381_v30  ;;  %v7425_v28 = vld [vmem:[%s9702_s2 + $0x288] sm:$0xff]   ;;  %v7427_v30 = vld [vmem:[%s9702_s2 + $0x2d0] sm:$0xff]  }
  0x1e   :  { %6623 = vmatprep.subr.bf16.mxu1 %v7382_v31  ;;  %v7428_v31 = vld [vmem:[%s9702_s2 + $0x210] sm:$0xff]  }
  0x20   :  { %6602 = vmatpush3.bf16.msra.mxu0 %v7383_v32  ;;  %v7429_v32 = vld [vmem:[%s9702_s2 + $0x290] sm:$0xff]  }
  0x21   :  { %6624 = vmatpush3.bf16.msra.mxu1 %v7384_v33  ;;  %6631 = vmatprep.subr.bf16.mxu0 %v7386_v36  ;;  %v7430_v33 = vld [vmem:[%s9702_s2 + $0x258] sm:$0xff]  }
  0x22   :  { %6653 = vmatprep.subr.bf16.mxu1 %v7387_v39  ;;  %v7432_v36 = vld [vmem:[%s9702_s2 + $0x218] sm:$0xff]   ;;  %v7435_v39 = vld [vmem:[%s9702_s2 + $0x2e0] sm:$0xff]  }
  0x23   :  { %4641 = vmatmul.mubr.bf16.vlgmr.msra.gmra.mrb[0].mxu0 %v1103_v46  ;;  %v7441_v46 = vld [vmem:[%s9702_s2 + $0x2a8] sm:$0xff]  }
  0x24   :  { %6632 = vmatpush3.bf16.msra.mxu0 %v7388_v48  ;;  %4681 = vmatmul.mubr.bf16.vlgmr.msra.gmra.mrb[0].mxu1 %v1125_v52  ;;  %v29_v48 = vld [vmem:[%s9700_s0 + $0x8] sm:$0xff]  ;;  %v7444_v52 = vld [vmem:[%s9702_s2 + $0x230] sm:$0xff]  }
  0x25   :  { %6633 = vmatprep.subr.bf16.mxu0 %v7390_v53  ;;  %6654 = vmatpush3.bf16.msra.mxu1 %v7389_v50  ;;  %v1136_v50 = vrot.slane %v29_v48, %v8060_v42  ;;  %v7445_v53 = vld [vmem:[%s9702_s2 + $0x2b0] sm:$0xff]  }
  0x26   :  { %4720 = vmatprep.mubr.bf16.mxu0 %v1124_v51  ;;  %6655 = vmatprep.subr.bf16.mxu1 %v7391_v55  ;;  %v1129_v51 = vcombine.high %v29_v48, %v29_v48  ;;  %v7491_v48 = vld [vmem:[%s9702_s2 + $0x450] sm:$0xff]  }
  0x27   :  { %4760 = vmatprep.mubr.bf16.mxu1 %v1128_v57  ;;  %v1144_v54 = vcombine.high %v1136_v50, %v1136_v50  ;;  %v7447_v57 = vld [vmem:[%s9702_s2 + $0x2f8] sm:$0xff]  }
  0x28   :  { %6634 = vmatpush3.bf16.msra.mxu0 %v7392_v56  ;;  %v8252_v55 = vrot.slane %v1129_v51, %v8060_v42  ;;  %v7446_v56 = vld [vmem:[%s9702_s2 + $0x278] sm:$0xff]   ;;  %v7494_v51 = vld [vmem:[%s9702_s2 + $0x490] sm:$0xff]  }
  0x29   :  { %6635 = vmatprep.subr.bf16.mxu0 %v7394_v59  ;;  %6656 = vmatpush3.bf16.msra.mxu1 %v7393_v58  ;;  %v1166_v58 = vrot.slane %v1144_v54, %v8060_v42  ;;  %v7497_v54 = vld [vmem:[%s9702_s2 + $0x418] sm:$0xff]  }
  0x2a   :  { %6657 = vmatprep.subr.bf16.mxu1 %v7395_v60  ;;  %v1145_v59 = vcombine.high %v8252_v55, %v8252_v55  ;;  %v7448_v60 = vld [vmem:[%s9702_s2 + $0x238] sm:$0xff]  }
  0x2c   :  { %6636 = vmatpush3.bf16.msra.mxu0 %v7396_v61  ;;  %v7449_v61 = vld [vmem:[%s9702_s2 + $0x2b8] sm:$0xff]  }
  0x2d   :  { %6637 = vmatprep.subr.bf16.mxu0 %v7398_v63  ;;  %6658 = vmatpush3.bf16.msra.mxu1 %v7397_v62  ;;  %v1176_v62 = vcombine.high %v1166_v58, %v1166_v58  ;;  %v1152_v63 = vrot.slane %v1136_v50, %v8060_v42  ;;  %v7493_v50 = vld [vmem:[%s9702_s2 + $0x410] sm:$0xff]  }
  0x2e   :  { %6659 = vmatprep.subr.bf16.mxu1 %v7399_v0  ;;  %v7450_v0 = vld [vmem:[%s9702_s2 + $0x340] sm:$0xff]  }
  0x30   :  { %6638 = vmatpush3.bf16.msra.mxu0 %v7400_v1  ;;  %v7451_v1 = vld [vmem:[%s9702_s2 + $0x3c0] sm:$0xff]  }
  0x31   :  { %6639 = vmatprep.subr.bf16.mxu0 %v7402_v3  ;;  %6660 = vmatpush3.bf16.msra.mxu1 %v7401_v2  ;;  %v1173_v2 = vrot.slane %v1145_v59, %v8060_v42  ;;  %v7452_v3 = vld [vmem:[%s9702_s2 + $0x300] sm:$0xff]  }
  0x32   :  { %6661 = vmatprep.subr.bf16.mxu1 %v7403_v4  ;;  %v7453_v4 = vld [vmem:[%s9702_s2 + $0x380] sm:$0xff]  }
  0x33   :  { %v7502_v59 = vld [vmem:[%s9702_s2 + $0x4a0] sm:$0xff]  }
  0x34   :  { %6640 = vmatpush3.bf16.msra.mxu0 %v7404_v5  ;;  %v1174_v5 = vcombine.high %v1152_v63, %v1152_v63 }
  0x35   :  { %6641 = vmatprep.subr.bf16.mxu0 %v7406_v7  ;;  %6662 = vmatpush3.bf16.msra.mxu1 %v7405_v6  ;;  %v7454_v6 = vld [vmem:[%s9702_s2 + $0x348] sm:$0xff]  }
  0x36   :  { %6663 = vmatprep.subr.bf16.mxu1 %v7407_v8  ;;  %v7455_v7 = vld [vmem:[%s9702_s2 + $0x3c8] sm:$0xff]   ;;  %v1177_v8 = vcombine.high %v1173_v2, %v1173_v2 }
  0x38   :  { %6642 = vmatpush3.bf16.msra.mxu0 %v7408_v9  ;;  %v7456_v9 = vld [vmem:[%s9702_s2 + $0x308] sm:$0xff]  }
  0x39   :  { %6643 = vmatprep.subr.bf16.mxu0 %v7410_v11  ;;  %6664 = vmatpush3.bf16.msra.mxu1 %v7409_v10  ;;  %v7457_v10 = vld [vmem:[%s9702_s2 + $0x388] sm:$0xff]   ;;  %v7458_v11 = vld [vmem:[%s9702_s2 + $0x350] sm:$0xff]  }
  0x3a   :  { %6665 = vmatprep.subr.bf16.mxu1 %v7411_v12  ;;  %v7459_v12 = vld [vmem:[%s9702_s2 + $0x3d0] sm:$0xff]  }
  0x3c   :  { %6644 = vmatpush3.bf16.msra.mxu0 %v7412_v13  ;;  %v7460_v13 = vld [vmem:[%s9702_s2 + $0x310] sm:$0xff]  }
  0x3d   :  { %6645 = vmatprep.subr.bf16.mxu0 %v7414_v15  ;;  %6666 = vmatpush3.bf16.msra.mxu1 %v7413_v14  ;;  %v7461_v14 = vld [vmem:[%s9702_s2 + $0x390] sm:$0xff]   ;;  %v7462_v15 = vld [vmem:[%s9702_s2 + $0x358] sm:$0xff]  }
  0x3e   :  { %6667 = vmatprep.subr.bf16.mxu1 %v7415_v16  ;;  %v7463_v16 = vld [vmem:[%s9702_s2 + $0x3d8] sm:$0xff]  }
  0x40   :  { %6646 = vmatpush3.bf16.msra.mxu0 %v7416_v17  ;;  %v7464_v17 = vld [vmem:[%s9702_s2 + $0x318] sm:$0xff]  }
  0x41   :  { %6675 = vmatprep.subr.bf16.mxu0 %v7418_v20  ;;  %6668 = vmatpush3.bf16.msra.mxu1 %v7417_v18  ;;  %v1060_v18 = vld [vmem:[%s9701_s1] sm:$0x3] }
  0x42   :  { %6697 = vmatprep.subr.bf16.mxu1 %v7419_v21  ;;  %1064 = vperm.xlu0 %7344, %v1060_v18   ;;  %v7466_v20 = vld [vmem:[%s9702_s2 + $0x360] sm:$0xff]  }
  0x43   :  { %4721 = vmatmul.mubr.bf16.vlgmr.msra.gmra.mrb[4].mxu0 %v1110_v19  ;;  %v7465_v19 = vld [vmem:[%s9702_s2 + $0x398] sm:$0xff]   ;;  %v7467_v21 = vld [vmem:[%s9702_s2 + $0x3e0] sm:$0xff]  }
  0x44   :  { %6676 = vmatpush3.bf16.msra.mxu0 %v7420_v22  ;;  %4761 = vmatmul.mubr.bf16.vlgmr.msra.gmra.mrb[4].mxu1 %v1126_v24  ;;  %v7468_v22 = vld [vmem:[%s9702_s2 + $0x320] sm:$0xff]   ;;  %v7470_v24 = vld [vmem:[%s9702_s2 + $0x368] sm:$0xff]  }
  0x45   :  { %6677 = vmatprep.subr.bf16.mxu0 %v7422_v25  ;;  %6698 = vmatpush3.bf16.msra.mxu1 %v7421_v23  ;;  %v7469_v23 = vld [vmem:[%s9702_s2 + $0x3a0] sm:$0xff]   ;;  %v7471_v25 = vld [vmem:[%s9702_s2 + $0x3e8] sm:$0xff]  }
  0x46   :  { %6699 = vmatprep.subr.bf16.mxu1 %v7423_v26  ;;  %4800 = vmatprep.mubr.bf16.mxu0 %v1166_v58  ;;  %v7472_v26 = vld [vmem:[%s9702_s2 + $0x328] sm:$0xff]   ;;  %v7501_v58 = vld [vmem:[%s9702_s2 + $0x420] sm:$0xff]  }
  0x47   :  { %4840 = vmatprep.mubr.bf16.mxu1 %v1176_v62  ;;  %v7505_v62 = vld [vmem:[%s9702_s2 + $0x428] sm:$0xff]  }
  0x48   :  { %6678 = vmatpush3.bf16.msra.mxu0 %v7424_v27  ;;  %v7473_v27 = vld [vmem:[%s9702_s2 + $0x3a8] sm:$0xff]  }
  0x49   :  { %6679 = vmatprep.subr.bf16.mxu0 %v7426_v29  ;;  %6700 = vmatpush3.bf16.msra.mxu1 %v7425_v28  ;;  %v7474_v28 = vld [vmem:[%s9702_s2 + $0x370] sm:$0xff]  }
  0x4a   :  { %6701 = vmatprep.subr.bf16.mxu1 %v7427_v30  ;;  %v7475_v29 = vld [vmem:[%s9702_s2 + $0x3f0] sm:$0xff]  }
  0x4b   :  { %v7476_v30 = vld [vmem:[%s9702_s2 + $0x330] sm:$0xff]  }
  0x4c   :  { %6680 = vmatpush3.bf16.msra.mxu0 %v7428_v31  ;;  %v7477_v31 = vld [vmem:[%s9702_s2 + $0x3b0] sm:$0xff]  }
  0x4d   :  { %6681 = vmatprep.subr.bf16.mxu0 %v7430_v33  ;;  %6702 = vmatpush3.bf16.msra.mxu1 %v7429_v32  ;;  %v7478_v32 = vld [vmem:[%s9702_s2 + $0x378] sm:$0xff]  }
  0x4e   :  { %6703 = vmatprep.subr.bf16.mxu1 %v7431_v35  ;;  %v7479_v33 = vld [vmem:[%s9702_s2 + $0x3f8] sm:$0xff]  }
  0x4f   :  { %v7480_v35 = vld [vmem:[%s9702_s2 + $0x338] sm:$0xff]  }
  0x50   :  { %6682 = vmatpush3.bf16.msra.mxu0 %v7432_v36  ;;  %v7481_v36 = vld [vmem:[%s9702_s2 + $0x3b8] sm:$0xff]  }
  0x51   :  { %6683 = vmatprep.subr.bf16.mxu0 %v7434_v38  ;;  %6704 = vmatpush3.bf16.msra.mxu1 %v7433_v37  ;;  %v1159_v37 = vrot.slane %v8252_v55, %v8060_v42  ;;  %v7483_v38 = vld [vmem:[%s9702_s2 + $0x440] sm:$0xff]   ;;  %v7498_v55 = vld [vmem:[%s9702_s2 + $0x498] sm:$0xff]  }
  0x52   :  { %6705 = vmatprep.subr.bf16.mxu1 %v7435_v39  ;;  %v7484_v39 = vld [vmem:[%s9702_s2 + $0x4c0] sm:$0xff]  }
  0x54   :  { %6684 = vmatpush3.bf16.msra.mxu0 %v7436_v40  ;;  %v7485_v40 = vld [vmem:[%s9702_s2 + $0x400] sm:$0xff]  }
  0x55   :  { %6685 = vmatprep.subr.bf16.mxu0 %v7438_v43  ;;  %6706 = vmatpush3.bf16.msra.mxu1 %v7437_v41  ;;  %v7486_v41 = vld [vmem:[%s9702_s2 + $0x480] sm:$0xff]   ;;  %v1175_v43 = vcombine.high %v1159_v37, %v1159_v37 }
  0x56   :  { %6707 = vmatprep.subr.bf16.mxu1 %v7439_v44  ;;  %v7487_v44 = vld [vmem:[%s9702_s2 + $0x448] sm:$0xff]  }
  0x58   :  { %6686 = vmatpush3.bf16.msra.mxu0 %v7440_v45  ;;  %v7488_v45 = vld [vmem:[%s9702_s2 + $0x4c8] sm:$0xff]  }
  0x59   :  { %6687 = vmatprep.subr.bf16.mxu0 %v7442_v47  ;;  %6708 = vmatpush3.bf16.msra.mxu1 %v7441_v46  ;;  %v7489_v46 = vld [vmem:[%s9702_s2 + $0x408] sm:$0xff]  }
  0x5a   :  { %6709 = vmatprep.subr.bf16.mxu1 %v7443_v49  ;;  %v7490_v47 = vld [vmem:[%s9702_s2 + $0x488] sm:$0xff]   ;;  %v7492_v49 = vld [vmem:[%s9702_s2 + $0x4d0] sm:$0xff]  }
  0x5c   :  { %6688 = vmatpush3.bf16.msra.mxu0 %v7444_v52  ;;  %v7495_v52 = vld [vmem:[%s9702_s2 + $0x458] sm:$0xff]  }
  0x5d   :  { %6689 = vmatprep.subr.bf16.mxu0 %v7446_v56  ;;  %6710 = vmatpush3.bf16.msra.mxu1 %v7445_v53  ;;  %v7496_v53 = vld [vmem:[%s9702_s2 + $0x4d8] sm:$0xff]   ;;  %v7499_v56 = vld [vmem:[%s9702_s2 + $0x460] sm:$0xff]  }
  0x5e   :  { %6711 = vmatprep.subr.bf16.mxu1 %v7447_v57  ;;  %v7500_v57 = vld [vmem:[%s9702_s2 + $0x4e0] sm:$0xff]  }
  0x60   :  { %6690 = vmatpush3.bf16.msra.mxu0 %v7448_v60  ;;  %v7503_v60 = vld [vmem:[%s9702_s2 + $0x468] sm:$0xff]  }
  0x61   :  { %6719 = vmatprep.subr.bf16.mxu0 %v7450_v0  ;;  %6712 = vmatpush3.bf16.msra.mxu1 %v7449_v61  ;;  %v7504_v61 = vld [vmem:[%s9702_s2 + $0x4e8] sm:$0xff]   ;;  %v7507_v0 = vld [vmem:[%s9702_s2 + $0x470] sm:$0xff]  }
  0x62   :  { %6741 = vmatprep.subr.bf16.mxu1 %v7451_v1  ;;  %v30_v1 = vld [vmem:[%s9700_s0 + $0x10] sm:$0xff] }
  0x63   :  { %4801 = vmatmul.mubr.bf16.vlgmr.msra.gmra.mrb[8].mxu0 %v1152_v63  ;;  %v7506_v63 = vld [vmem:[%s9702_s2 + $0x4a8] sm:$0xff]  }
  0x64   :  { %6720 = vmatpush3.bf16.msra.mxu0 %v7452_v3  ;;  %4880 = vmatprep.mubr.bf16.mxu0 %v1173_v2  ;;  %v7508_v2 = vld [vmem:[%s9702_s2 + $0x4f0] sm:$0xff]   ;;  %v1185_v3 = vrot.slane %v30_v1, %v8060_v42 }
  0x65   :  { %4841 = vmatmul.mubr.bf16.vlgmr.msra.gmra.mrb[8].mxu1 %v1174_v5  ;;  %6721 = vmatprep.subr.bf16.mxu0 %v7454_v6  ;;  %v7509_v5 = vld [vmem:[%s9702_s2 + $0x430] sm:$0xff]   ;;  %v7511_v6 = vld [vmem:[%s9702_s2 + $0x478] sm:$0xff]  }
  0x66   :  { %6742 = vmatpush3.bf16.msra.mxu1 %v7453_v4  ;;  %4920 = vmatprep.mubr.bf16.mxu1 %v1177_v8  ;;  %v1178_v4 = vcombine.high %v30_v1, %v30_v1  ;;  %v7557_v1 = vld [vmem:[%s9702_s2 + $0x6d0] sm:$0xff]  }
  0x67   :  { %6743 = vmatprep.subr.bf16.mxu1 %v7455_v7  ;;  %v1193_v7 = vcombine.high %v1185_v3, %v1185_v3 }
  0x68   :  { %6722 = vmatpush3.bf16.msra.mxu0 %v7456_v9  ;;  %v8461_v8 = vrot.slane %v1178_v4, %v8060_v42  ;;  %v7510_v9 = vld [vmem:[%s9702_s2 + $0x4b0] sm:$0xff]  }
  0x69   :  { %6723 = vmatprep.subr.bf16.mxu0 %v7458_v11  ;;  %v1215_v11 = vrot.slane %v1193_v7, %v8060_v42  ;;  %v7559_v4 = vld [vmem:[%s9702_s2 + $0x690] sm:$0xff]   ;;  %v7564_v7 = vld [vmem:[%s9702_s2 + $0x660] sm:$0xff]  }
  0x6a   :  { %6744 = vmatpush3.bf16.msra.mxu1 %v7457_v10  ;;  %v7512_v10 = vld [vmem:[%s9702_s2 + $0x4f8] sm:$0xff]  }
  0x6b   :  { %6745 = vmatprep.subr.bf16.mxu1 %v7459_v12  ;;  %v1194_v12 = vcombine.high %v8461_v8, %v8461_v8 }
  0x6c   :  { %6724 = vmatpush3.bf16.msra.mxu0 %v7460_v13  ;;  %v7513_v13 = vld [vmem:[%s9702_s2 + $0x438] sm:$0xff]  }
  0x6d   :  { %6725 = vmatprep.subr.bf16.mxu0 %v7462_v15  ;;  %v1201_v15 = vrot.slane %v1185_v3, %v8060_v42  ;;  %v1222_v18 = vrot.slane %v1194_v12, %v8060_v42  ;;  %v7560_v3 = vld [vmem:[%s9702_s2 + $0x658] sm:$0xff]   ;;  %v7567_v12 = vld [vmem:[%s9702_s2 + $0x6a0] sm:$0xff]  }
  0x6e   :  { %6746 = vmatpush3.bf16.msra.mxu1 %v7461_v14  ;;  %v1225_v14 = vcombine.high %v1215_v11, %v1215_v11 }
  0x6f   :  { %6747 = vmatprep.subr.bf16.mxu1 %v7463_v16  ;;  %v7515_v16 = vld [vmem:[%s9702_s2 + $0x540] sm:$0xff]  }
  0x70   :  { %6726 = vmatpush3.bf16.msra.mxu0 %v7464_v17  ;;  %v7514_v17 = vld [vmem:[%s9702_s2 + $0x4b8] sm:$0xff]  }
  0x71   :  { %6727 = vmatprep.subr.bf16.mxu0 %v7466_v20  ;;  %v7517_v20 = vld [vmem:[%s9702_s2 + $0x500] sm:$0xff]  }
  0x72   :  { %6748 = vmatpush3.bf16.msra.mxu1 %v7465_v19  ;;  %v7516_v19 = vld [vmem:[%s9702_s2 + $0x5c0] sm:$0xff]  }
  0x73   :  { %6749 = vmatprep.subr.bf16.mxu1 %v7467_v21  ;;  %v1223_v21 = vcombine.high %v1201_v15, %v1201_v15 }
  0x74   :  { %6728 = vmatpush3.bf16.msra.mxu0 %v7468_v22  ;;  %v7519_v22 = vld [vmem:[%s9702_s2 + $0x548] sm:$0xff]  }
  0x75   :  { %6729 = vmatprep.subr.bf16.mxu0 %v7470_v24  ;;  %v1226_v24 = vcombine.high %v1222_v18, %v1222_v18 }
  0x76   :  { %6750 = vmatpush3.bf16.msra.mxu1 %v7469_v23  ;;  %v7518_v23 = vld [vmem:[%s9702_s2 + $0x580] sm:$0xff]  }
  0x77   :  { %6751 = vmatprep.subr.bf16.mxu1 %v7471_v25  ;;  %v7520_v25 = vld [vmem:[%s9702_s2 + $0x5c8] sm:$0xff]  }
  0x78   :  { %6730 = vmatpush3.bf16.msra.mxu0 %v7472_v26  ;;  %v7521_v26 = vld [vmem:[%s9702_s2 + $0x508] sm:$0xff]  }
  0x79   :  { %6731 = vmatprep.subr.bf16.mxu0 %v7474_v28  ;;  %v7522_v28 = vld [vmem:[%s9702_s2 + $0x588] sm:$0xff]  }
  0x7a   :  { %6752 = vmatpush3.bf16.msra.mxu1 %v7473_v27  ;;  %v7523_v27 = vld [vmem:[%s9702_s2 + $0x550] sm:$0xff]  }
  0x7b   :  { %6753 = vmatprep.subr.bf16.mxu1 %v7475_v29  ;;  %v7524_v29 = vld [vmem:[%s9702_s2 + $0x5d0] sm:$0xff]  }
  0x7c   :  { %6732 = vmatpush3.bf16.msra.mxu0 %v7476_v30  ;;  %v7525_v30 = vld [vmem:[%s9702_s2 + $0x510] sm:$0xff]  }
  0x7d   :  { %6733 = vmatprep.subr.bf16.mxu0 %v7478_v32  ;;  %v7526_v32 = vld [vmem:[%s9702_s2 + $0x590] sm:$0xff]  }
  0x7e   :  { %6754 = vmatpush3.bf16.msra.mxu1 %v7477_v31  ;;  %v7527_v31 = vld [vmem:[%s9702_s2 + $0x558] sm:$0xff]  }
  0x7f   :  { %6755 = vmatprep.subr.bf16.mxu1 %v7479_v33  ;;  %v7528_v33 = vld [vmem:[%s9702_s2 + $0x5d8] sm:$0xff]  }
  0x80   :  { %6734 = vmatpush3.bf16.msra.mxu0 %v7480_v35  ;;  %v7529_v35 = vld [vmem:[%s9702_s2 + $0x518] sm:$0xff]  }
  0x81   :  { %6763 = vmatprep.subr.bf16.mxu0 %v7483_v38  ;;  %v7532_v38 = vld [vmem:[%s9702_s2 + $0x5e0] sm:$0xff]  }
  0x82   :  { %6756 = vmatpush3.bf16.msra.mxu1 %v7481_v36  ;;  %v7531_v36 = vld [vmem:[%s9702_s2 + $0x560] sm:$0xff]  }
  0x83   :  { %4881 = vmatmul.mubr.bf16.vlgmr.msra.gmra.mrb[12].mxu0 %v1159_v37  ;;  %6785 = vmatprep.subr.bf16.mxu1 %v7484_v39  ;;  %v7530_v37 = vld [vmem:[%s9702_s2 + $0x598] sm:$0xff]   ;;  %v7533_v39 = vld [vmem:[%s9702_s2 + $0x520] sm:$0xff]  }
  0x84   :  { %6764 = vmatpush3.bf16.msra.mxu0 %v7485_v40  ;;  %4960 = vmatprep.mubr.bf16.mxu0 %v1215_v11  ;;  %v7535_v40 = vld [vmem:[%s9702_s2 + $0x568] sm:$0xff]  }
  0x85   :  { %4921 = vmatmul.mubr.bf16.vlgmr.msra.gmra.mrb[12].mxu1 %v1175_v43  ;;  %6765 = vmatprep.subr.bf16.mxu0 %v7487_v44  ;;  %v7536_v43 = vld [vmem:[%s9702_s2 + $0x5e8] sm:$0xff]  }
  0x86   :  { %6786 = vmatpush3.bf16.msra.mxu1 %v7486_v41  ;;  %5000 = vmatprep.mubr.bf16.mxu1 %v1225_v14  ;;  %v7534_v41 = vld [vmem:[%s9702_s2 + $0x5a0] sm:$0xff]   ;;  %v7537_v44 = vld [vmem:[%s9702_s2 + $0x528] sm:$0xff]  }
  0x87   :  { %6787 = vmatprep.subr.bf16.mxu1 %v7488_v45  ;;  %v7539_v45 = vld [vmem:[%s9702_s2 + $0x570] sm:$0xff]   ;;  %v7568_v11 = vld [vmem:[%s9702_s2 + $0x668] sm:$0xff]  }
  0x88   :  { %6766 = vmatpush3.bf16.msra.mxu0 %v7489_v46  ;;  %v7538_v46 = vld [vmem:[%s9702_s2 + $0x5a8] sm:$0xff]  }
  0x89   :  { %6767 = vmatprep.subr.bf16.mxu0 %v7491_v48  ;;  %v7541_v48 = vld [vmem:[%s9702_s2 + $0x530] sm:$0xff]   ;;  %v7570_v14 = vld [vmem:[%s9702_s2 + $0x628] sm:$0xff]  }
  0x8a   :  { %6788 = vmatpush3.bf16.msra.mxu1 %v7490_v47  ;;  %v7540_v47 = vld [vmem:[%s9702_s2 + $0x5f0] sm:$0xff]  }
  0x8b   :  { %6789 = vmatprep.subr.bf16.mxu1 %v7492_v49  ;;  %v7543_v49 = vld [vmem:[%s9702_s2 + $0x578] sm:$0xff]  }
  0x8c   :  { %6768 = vmatpush3.bf16.msra.mxu0 %v7493_v50  ;;  %v7542_v50 = vld [vmem:[%s9702_s2 + $0x5b0] sm:$0xff]  }
  0x8d   :  { %6769 = vmatprep.subr.bf16.mxu0 %v7495_v52  ;;  %v7545_v52 = vld [vmem:[%s9702_s2 + $0x538] sm:$0xff]  }
  0x8e   :  { %6790 = vmatpush3.bf16.msra.mxu1 %v7494_v51  ;;  %v7544_v51 = vld [vmem:[%s9702_s2 + $0x5f8] sm:$0xff]  }
  0x8f   :  { %6791 = vmatprep.subr.bf16.mxu1 %v7496_v53  ;;  %v1208_v53 = vrot.slane %v8461_v8, %v8060_v42  ;;  %v7563_v8 = vld [vmem:[%s9702_s2 + $0x698] sm:$0xff]  }
  0x90   :  { %6770 = vmatpush3.bf16.msra.mxu0 %v7497_v54  ;;  %v7548_v54 = vld [vmem:[%s9702_s2 + $0x640] sm:$0xff]  }
  0x91   :  { %6771 = vmatprep.subr.bf16.mxu0 %v7499_v56  ;;  %v7549_v56 = vld [vmem:[%s9702_s2 + $0x6c0] sm:$0xff]  }
  0x92   :  { %6792 = vmatpush3.bf16.msra.mxu1 %v7498_v55  ;;  %v7546_v55 = vld [vmem:[%s9702_s2 + $0x5b8] sm:$0xff]  }
  0x93   :  { %6793 = vmatprep.subr.bf16.mxu1 %v7500_v57  ;;  %v7550_v57 = vld [vmem:[%s9702_s2 + $0x600] sm:$0xff]  }
  0x94   :  { %6772 = vmatpush3.bf16.msra.mxu0 %v7501_v58  ;;  %v1224_v58 = vcombine.high %v1208_v53, %v1208_v53 }
  0x95   :  { %6773 = vmatprep.subr.bf16.mxu0 %v7503_v60  ;;  %v7551_v60 = vld [vmem:[%s9702_s2 + $0x680] sm:$0xff]  }
  0x96   :  { %6794 = vmatpush3.bf16.msra.mxu1 %v7502_v59  ;;  %v7552_v59 = vld [vmem:[%s9702_s2 + $0x648] sm:$0xff]  }
  0x97   :  { %6795 = vmatprep.subr.bf16.mxu1 %v7504_v61  ;;  %v7553_v61 = vld [vmem:[%s9702_s2 + $0x6c8] sm:$0xff]  }
  0x98   :  { %6774 = vmatpush3.bf16.msra.mxu0 %v7505_v62  ;;  %v7554_v62 = vld [vmem:[%s9702_s2 + $0x608] sm:$0xff]  }
  0x99   :  { %6775 = vmatprep.subr.bf16.mxu0 %v7507_v0  ;;  %v7555_v0 = vld [vmem:[%s9702_s2 + $0x688] sm:$0xff]  }
  0x9a   :  { %6796 = vmatpush3.bf16.msra.mxu1 %v7506_v63  ;;  %v7556_v63 = vld [vmem:[%s9702_s2 + $0x650] sm:$0xff]  }
  0x9b   :  { %6797 = vmatprep.subr.bf16.mxu1 %v7508_v2  ;;  %v7558_v2 = vld [vmem:[%s9702_s2 + $0x610] sm:$0xff]  }
  0x9c   :  { %6776 = vmatpush3.bf16.msra.mxu0 %v7509_v5  ;;  %v7561_v5 = vld [vmem:[%s9702_s2 + $0x6d8] sm:$0xff]  }
  0x9d   :  { %6777 = vmatprep.subr.bf16.mxu0 %v7511_v6  ;;  %v7562_v6 = vld [vmem:[%s9702_s2 + $0x618] sm:$0xff]  }
  0x9e   :  { %6798 = vmatpush3.bf16.msra.mxu1 %v7510_v9  ;;  %v7565_v9 = vld [vmem:[%s9702_s2 + $0x6e0] sm:$0xff]  }
  0x9f   :  { %6799 = vmatprep.subr.bf16.mxu1 %v7512_v10  ;;  %v7566_v10 = vld [vmem:[%s9702_s2 + $0x620] sm:$0xff]  }
  0xa0   :  { %6778 = vmatpush3.bf16.msra.mxu0 %v7513_v13  ;;  %v7569_v13 = vld [vmem:[%s9702_s2 + $0x6e8] sm:$0xff]  }
  0xa1   :  { %6807 = vmatprep.subr.bf16.mxu0 %v7515_v16  ;;  %v7571_v16 = vld [vmem:[%s9702_s2 + $0x6a8] sm:$0xff]  }
  0xa2   :  { %6800 = vmatpush3.bf16.msra.mxu1 %v7514_v17  ;;  %v31_v17 = vld [vmem:[%s9700_s0 + $0x18] sm:$0xff] }
  0xa3   :  { %4961 = vmatmul.mubr.bf16.vlgmr.msra.gmra.mrb[16].mxu0 %v1201_v15  ;;  %6829 = vmatprep.subr.bf16.mxu1 %v7516_v19  ;;  %v7572_v15 = vld [vmem:[%s9702_s2 + $0x670] sm:$0xff]   ;;  %v1234_v19 = vrot.slane %v31_v17, %v8060_v42 }
  0xa4   :  { %6808 = vmatpush3.bf16.msra.mxu0 %v7517_v20  ;;  %5040 = vmatprep.mubr.bf16.mxu0 %v1222_v18  ;;  %v7573_v18 = vld [vmem:[%s9702_s2 + $0x6f0] sm:$0xff]   ;;  %v1227_v20 = vcombine.high %v31_v17, %v31_v17 }
  0xa5   :  { %5001 = vmatmul.mubr.bf16.vlgmr.msra.gmra.mrb[16].mxu1 %v1223_v21  ;;  %6809 = vmatprep.subr.bf16.mxu0 %v7519_v22  ;;  %v7574_v21 = vld [vmem:[%s9702_s2 + $0x630] sm:$0xff]   ;;  %v7576_v22 = vld [vmem:[%s9702_s2 + $0x678] sm:$0xff]  }
  0xa6   :  { %6830 = vmatpush3.bf16.msra.mxu1 %v7518_v23  ;;  %5080 = vmatprep.mubr.bf16.mxu1 %v1226_v24  ;;  %v1242_v23 = vcombine.high %v1234_v19, %v1234_v19  ;;  %v8667_v24 = vrot.slane %v1227_v20, %v8060_v42  ;;  %v7610_v20 = vld [vmem:[%s9702_s2 + $0x738] sm:$0xff]  }
  0xa7   :  { %6831 = vmatprep.subr.bf16.mxu1 %v7520_v25  ;;  %v7575_v25 = vld [vmem:[%s9702_s2 + $0x6b0] sm:$0xff]  }
  0xa8   :  { %6810 = vmatpush3.bf16.msra.mxu0 %v7521_v26  ;;  %v7577_v26 = vld [vmem:[%s9702_s2 + $0x6f8] sm:$0xff]  }
  0xa9   :  { %6811 = vmatprep.subr.bf16.mxu0 %v7523_v27  ;;  %v1264_v27 = vrot.slane %v1242_v23, %v8060_v42  ;;  %v1257_v23 = vrot.slane %v8667_v24, %v8060_v42 }
  0xaa   :  { %6832 = vmatpush3.bf16.msra.mxu1 %v7522_v28  ;;  %v1243_v28 = vcombine.high %v8667_v24, %v8667_v24 }
  0xab   :  { %6833 = vmatprep.subr.bf16.mxu1 %v7524_v29  ;;  %v7578_v29 = vld [vmem:[%s9702_s2 + $0x638] sm:$0xff]   ;;  %v1273_v24 = vcombine.high %v1257_v23, %v1257_v23 }
  0xac   :  { %6812 = vmatpush3.bf16.msra.mxu0 %v7525_v30  ;;  %v1274_v30 = vcombine.high %v1264_v27, %v1264_v27 }
  0xad   :  { %6813 = vmatprep.subr.bf16.mxu0 %v7527_v31  ;;  %v1250_v31 = vrot.slane %v1234_v19, %v8060_v42 }
  0xae   :  { %6834 = vmatpush3.bf16.msra.mxu1 %v7526_v32  ;;  %v7580_v32 = vld [vmem:[%s9702_s2 + $0x740] sm:$0xff]  }
  0xaf   :  { %6835 = vmatprep.subr.bf16.mxu1 %v7528_v33  ;;  %v7579_v33 = vld [vmem:[%s9702_s2 + $0x6b8] sm:$0xff]  }
  0xb0   :  { %6814 = vmatpush3.bf16.msra.mxu0 %v7529_v35  ;;  %v1271_v35 = vrot.slane %v1243_v28, %v8060_v42  ;;  %v7616_v28 = vld [vmem:[%s9702_s2 + $0x880] sm:$0xff]  }
  0xb1   :  { %6815 = vmatprep.subr.bf16.mxu0 %v7531_v36  ;;  %v7581_v36 = vld [vmem:[%s9702_s2 + $0x7c0] sm:$0xff]  }
  0xb2   :  { %6836 = vmatpush3.bf16.msra.mxu1 %v7530_v37  ;;  %v7582_v37 = vld [vmem:[%s9702_s2 + $0x700] sm:$0xff]  }
  0xb3   :  { %6837 = vmatprep.subr.bf16.mxu1 %v7532_v38  ;;  %v1272_v38 = vcombine.high %v1250_v31, %v1250_v31 }
  0xb4   :  { %6816 = vmatpush3.bf16.msra.mxu0 %v7533_v39  ;;  %v7584_v39 = vld [vmem:[%s9702_s2 + $0x748] sm:$0xff]  }
  0xb5   :  { %6817 = vmatprep.subr.bf16.mxu0 %v7535_v40  ;;  %v7583_v40 = vld [vmem:[%s9702_s2 + $0x780] sm:$0xff]  }
  0xb6   :  { %6838 = vmatpush3.bf16.msra.mxu1 %v7534_v41  ;;  %v1275_v41 = vcombine.high %v1271_v35, %v1271_v35 }
  0xb7   :  { %6839 = vmatprep.subr.bf16.mxu1 %v7536_v43  ;;  %v7585_v43 = vld [vmem:[%s9702_s2 + $0x7c8] sm:$0xff]  }
  0xb8   :  { %6818 = vmatpush3.bf16.msra.mxu0 %v7537_v44  ;;  %v7586_v44 = vld [vmem:[%s9702_s2 + $0x708] sm:$0xff]  }
  0xb9   :  { %6819 = vmatprep.subr.bf16.mxu0 %v7539_v45  ;;  %v7588_v45 = vld [vmem:[%s9702_s2 + $0x750] sm:$0xff]  }
  0xba   :  { %6840 = vmatpush3.bf16.msra.mxu1 %v7538_v46  ;;  %v7587_v46 = vld [vmem:[%s9702_s2 + $0x788] sm:$0xff]  }
  0xbb   :  { %6841 = vmatprep.subr.bf16.mxu1 %v7540_v47  ;;  %v7589_v47 = vld [vmem:[%s9702_s2 + $0x7d0] sm:$0xff]  }
  0xbc   :  { %6820 = vmatpush3.bf16.msra.mxu0 %v7541_v48  ;;  %v7590_v48 = vld [vmem:[%s9702_s2 + $0x710] sm:$0xff]  }
  0xbd   :  { %6821 = vmatprep.subr.bf16.mxu0 %v7543_v49  ;;  %v7592_v49 = vld [vmem:[%s9702_s2 + $0x758] sm:$0xff]  }
  0xbe   :  { %6842 = vmatpush3.bf16.msra.mxu1 %v7542_v50  ;;  %v7591_v50 = vld [vmem:[%s9702_s2 + $0x790] sm:$0xff]  }
  0xbf   :  { %6843 = vmatprep.subr.bf16.mxu1 %v7544_v51  ;;  %v7593_v51 = vld [vmem:[%s9702_s2 + $0x7d8] sm:$0xff]  }
  0xc0   :  { %6822 = vmatpush3.bf16.msra.mxu0 %v7545_v52  ;;  %v7594_v52 = vld [vmem:[%s9702_s2 + $0x718] sm:$0xff]  }
  0xc1   :  { %6851 = vmatprep.subr.bf16.mxu0 %v7548_v54  ;;  %v7596_v54 = vld [vmem:[%s9702_s2 + $0x760] sm:$0xff]  }
  0xc2   :  { %6844 = vmatpush3.bf16.msra.mxu1 %v7546_v55  ;;  %v7597_v55 = vld [vmem:[%s9702_s2 + $0x7e0] sm:$0xff]  }
  0xc3   :  { %5041 = vmatmul.mubr.bf16.vlgmr.msra.gmra.mrb[20].mxu0 %v1208_v53  ;;  %6873 = vmatprep.subr.bf16.mxu1 %v7549_v56  ;;  %v7595_v53 = vld [vmem:[%s9702_s2 + $0x798] sm:$0xff]   ;;  %v7598_v56 = vld [vmem:[%s9702_s2 + $0x720] sm:$0xff]  }
  0xc4   :  { %6852 = vmatpush3.bf16.msra.mxu0 %v7550_v57  ;;  %5120 = vmatprep.mubr.bf16.mxu0 %v1264_v27  ;;  %v1069_v57 = vsub.s32 0, %v8048_v34  ;;  %v7615_v27 = vld [vmem:[%s9702_s2 + $0x800] sm:$0xff]  }
  0xc5   :  { %5081 = vmatmul.mubr.bf16.vlgmr.msra.gmra.mrb[20].mxu1 %v1224_v58  ;;  %6853 = vmatprep.subr.bf16.mxu0 %v7552_v59  ;;  %v1061_v58 = vld [vmem:[%s9703_s3] sm:$0xff] }
  0xc6   :  { %6874 = vmatpush3.bf16.msra.mxu1 %v7551_v60  ;;  %5160 = vmatprep.mubr.bf16.mxu1 %v1274_v30  ;;  %v7599_v59 = vld [vmem:[%s9702_s2 + $0x7a0] sm:$0xff]   ;;  %v7600_v60 = vld [vmem:[%s9702_s2 + $0x768] sm:$0xff]  }
  0xc7   :  { %6875 = vmatprep.subr.bf16.mxu1 %v7553_v61  ;;  %v1070_v61 = vrot.slane %v1061_v58, %v1069_v57  ;;  %v7618_v30 = vld [vmem:[%s9702_s2 + $0x8c8] sm:$0xff]  }
  0xc8   :  { %6854 = vmatpush3.bf16.msra.mxu0 %v7554_v62  ;;  %v7601_v62 = vld [vmem:[%s9702_s2 + $0x7e8] sm:$0xff]  }
  0xc9   :  { %6855 = vmatprep.subr.bf16.mxu0 %v7556_v63  ;;  %v1065_v63 = vpop.permute.xlu0 %1064 }
  0xca   :  { %6876 = vmatpush3.bf16.msra.mxu1 %v7555_v0  ;;  %v7602_v0 = vld [vmem:[%s9702_s2 + $0x728] sm:$0xff]  }
  0xcb   :  { %6877 = vmatprep.subr.bf16.mxu1 %v7557_v1  ;;  %v7603_v1 = vld [vmem:[%s9702_s2 + $0x7a8] sm:$0xff]  }
  0xcc   :  { %6856 = vmatpush3.bf16.msra.mxu0 %v7558_v2  ;;  %v7604_v2 = vld [vmem:[%s9702_s2 + $0x770] sm:$0xff]  }
  0xcd   :  { %6857 = vmatprep.subr.bf16.mxu0 %v7560_v3 }
  0xce   :  { %6878 = vmatpush3.bf16.msra.mxu1 %v7559_v4  ;;  %v1071_v4 = vmul.f32 %v1070_v61, %v1065_v63  ;;  %v7641_v61 = vld [vmem:[%s9702_s2 + $0x878] sm:$0xff]  }
  0xcf   :  { %6879 = vmatprep.subr.bf16.mxu1 %v7561_v5  ;;  %v7605_v5 = vld [vmem:[%s9702_s2 + $0x7f0] sm:$0xff]  }
  0xd0   :  { %6858 = vmatpush3.bf16.msra.mxu0 %v7562_v6 }
  0xd1   :  { %6859 = vmatprep.subr.bf16.mxu0 %v7564_v7  ;;  %v7606_v7 = vld [vmem:[%s9702_s2 + $0x730] sm:$0xff]  }
  0xd2   :  { %6880 = vmatpush3.bf16.msra.mxu1 %v7563_v8 }
  0xd3   :  { %6881 = vmatprep.subr.bf16.mxu1 %v7565_v9 }
  0xd4   :  { %6860 = vmatpush3.bf16.msra.mxu0 %v7566_v10 }
  0xd5   :  { %6861 = vmatprep.subr.bf16.mxu0 %v7568_v11 }
  0xd6   :  { %6882 = vmatpush3.bf16.msra.mxu1 %v7567_v12 }
  0xd7   :  { %6883 = vmatprep.subr.bf16.mxu1 %v7569_v13  ;;  %v7607_v13 = vld [vmem:[%s9702_s2 + $0x7b0] sm:$0xff]  }
  0xd8   :  { %6862 = vmatpush3.bf16.msra.mxu0 %v7570_v14  ;;  %v7608_v14 = vld [vmem:[%s9702_s2 + $0x778] sm:$0xff]  }
  0xd9   :  { %6863 = vmatprep.subr.bf16.mxu0 %v7572_v15 }
  0xda   :  { %6884 = vmatpush3.bf16.msra.mxu1 %v7571_v16 }
  0xdb   :  { %6885 = vmatprep.subr.bf16.mxu1 %v7573_v18  ;;  %v7609_v18 = vld [vmem:[%s9702_s2 + $0x7f8] sm:$0xff]  }
  0xdc   :  { %6864 = vmatpush3.bf16.msra.mxu0 %v7574_v21 }
  0xdd   :  { %6865 = vmatprep.subr.bf16.mxu0 %v7576_v22  ;;  %v7611_v22 = vld [vmem:[%s9702_s2 + $0x7b8] sm:$0xff]  }
  0xde   :  { %6886 = vmatpush3.bf16.msra.mxu1 %v7575_v25  ;;  %v7613_v25 = vld [vmem:[%s9702_s2 + $0x840] sm:$0xff]  }
  0xdf   :  { %6887 = vmatprep.subr.bf16.mxu1 %v7577_v26  ;;  %v7614_v26 = vld [vmem:[%s9702_s2 + $0x8c0] sm:$0xff]  }
  0xe0   :  { %6866 = vmatpush3.bf16.msra.mxu0 %v7578_v29  ;;  %v7617_v29 = vld [vmem:[%s9702_s2 + $0x848] sm:$0xff]  }
  0xe1   :  { %6895 = vmatprep.subr.bf16.mxu0 %v7580_v32  ;;  %v7620_v32 = vld [vmem:[%s9702_s2 + $0x888] sm:$0xff]  }
  0xe2   :  { %6888 = vmatpush3.bf16.msra.mxu1 %v7579_v33  ;;  %v7621_v33 = vld [vmem:[%s9702_s2 + $0x850] sm:$0xff]  }
  0xe3   :  { %5121 = vmatmul.mubr.bf16.vlgmr.msra.gmra.mrb[24].mxu0 %v1250_v31  ;;  %6917 = vmatprep.subr.bf16.mxu1 %v7581_v36  ;;  %v7619_v31 = vld [vmem:[%s9702_s2 + $0x808] sm:$0xff]   ;;  %v7623_v36 = vld [vmem:[%s9702_s2 + $0x810] sm:$0xff]  }
  0xe4   :  { %6896 = vmatpush3.bf16.msra.mxu0 %v7582_v37  ;;  %5200 = vmatprep.mubr.bf16.mxu0 %v1271_v35  ;;  %v7622_v35 = vld [vmem:[%s9702_s2 + $0x8d0] sm:$0xff]  }
  0xe5   :  { %5161 = vmatmul.mubr.bf16.vlgmr.msra.gmra.mrb[24].mxu1 %v1272_v38  ;;  %6897 = vmatprep.subr.bf16.mxu0 %v7584_v39  ;;  %v7624_v37 = vld [vmem:[%s9702_s2 + $0x890] sm:$0xff]   ;;  %v7625_v38 = vld [vmem:[%s9702_s2 + $0x858] sm:$0xff]  }
  0xe6   :  { %6918 = vmatpush3.bf16.msra.mxu1 %v7583_v40  ;;  %5240 = vmatprep.mubr.bf16.mxu1 %v1275_v41  ;;  %v7626_v39 = vld [vmem:[%s9702_s2 + $0x8d8] sm:$0xff]  }
  0xe7   :  { %6919 = vmatprep.subr.bf16.mxu1 %v7585_v43  ;;  %v7627_v40 = vld [vmem:[%s9702_s2 + $0x818] sm:$0xff]   ;;  %v7629_v43 = vld [vmem:[%s9702_s2 + $0x860] sm:$0xff]  }
  0xe8   :  { %6898 = vmatpush3.bf16.msra.mxu0 %v7586_v44  ;;  %v7628_v41 = vld [vmem:[%s9702_s2 + $0x898] sm:$0xff]   ;;  %v7630_v44 = vld [vmem:[%s9702_s2 + $0x8e0] sm:$0xff]  }
  0xe9   :  { %6899 = vmatprep.subr.bf16.mxu0 %v7588_v45  ;;  %v7631_v45 = vld [vmem:[%s9702_s2 + $0x820] sm:$0xff]  }
  0xea   :  { %6920 = vmatpush3.bf16.msra.mxu1 %v7587_v46  ;;  %v7632_v46 = vld [vmem:[%s9702_s2 + $0x8a0] sm:$0xff]  }
  0xeb   :  { %6921 = vmatprep.subr.bf16.mxu1 %v7589_v47  ;;  %v7633_v47 = vld [vmem:[%s9702_s2 + $0x868] sm:$0xff]  }
  0xec   :  { %6900 = vmatpush3.bf16.msra.mxu0 %v7590_v48  ;;  %v7634_v48 = vld [vmem:[%s9702_s2 + $0x8e8] sm:$0xff]  }
  0xed   :  { %6901 = vmatprep.subr.bf16.mxu0 %v7592_v49  ;;  %v7635_v49 = vld [vmem:[%s9702_s2 + $0x828] sm:$0xff]  }
  0xee   :  { %6922 = vmatpush3.bf16.msra.mxu1 %v7591_v50  ;;  %v7636_v50 = vld [vmem:[%s9702_s2 + $0x8a8] sm:$0xff]  }
  0xef   :  { %6923 = vmatprep.subr.bf16.mxu1 %v7593_v51  ;;  %v7637_v51 = vld [vmem:[%s9702_s2 + $0x870] sm:$0xff]  }
  0xf0   :  { %6902 = vmatpush3.bf16.msra.mxu0 %v7594_v52 }
  0xf1   :  { %6903 = vmatprep.subr.bf16.mxu0 %v7596_v54 }
  0xf2   :  { %6924 = vmatpush3.bf16.msra.mxu1 %v7595_v53  ;;  %v7638_v53 = vld [vmem:[%s9702_s2 + $0x8f0] sm:$0xff]  }
  0xf3   :  { %6925 = vmatprep.subr.bf16.mxu1 %v7597_v55  ;;  %v7639_v55 = vld [vmem:[%s9702_s2 + $0x830] sm:$0xff]  }
  0xf4   :  { %6904 = vmatpush3.bf16.msra.mxu0 %v7598_v56  ;;  %v32_v56 = vld [vmem:[%s9700_s0 + $0x20] sm:$0xff] }
  0xf5   :  { %6905 = vmatprep.subr.bf16.mxu0 %v7600_v60  ;;  %v7640_v60 = vld [vmem:[%s9702_s2 + $0x8b0] sm:$0xff]   ;;  %v1276_v63 = vcombine.high %v32_v56, %v32_v56 }
  0xf6   :  { %6926 = vmatpush3.bf16.msra.mxu1 %v7599_v59  ;;  %v6603_v3 = vpop.f32.mrb[0].mxu0 }
  0xf7   :  { %v6604_v6 = vpop.f32.mrb[1].mxu0  ;;  %6927 = vmatprep.subr.bf16.mxu1 %v7601_v62  ;;  %v6625_v8 = vpop.f32.mrb[0].mxu1  ;;  %v1283_v62 = vrot.slane %v32_v56, %v8060_v42  ;;  %v7673_v56 = vld [vmem:[%s9702_s2 + $0x978] sm:$0xff]  }
  0xf8   :  { %v6605_v9 = vadd.f32 %v6604_v6, %v6603_v3  ;;  %v6606_v10 = vpop.f32.mrb[2].mxu0  ;;  %6906 = vmatpush3.bf16.msra.mxu0 %v7602_v0  ;;  %v6626_v11 = vpop.f32.mrb[1].mxu1 }
  0xf9   :  { %v6607_v12 = vpop.f32.mrb[3].mxu0  ;;  %6907 = vmatprep.subr.bf16.mxu0 %v7604_v2  ;;  %v6627_v16 = vadd.f32 %v6626_v11, %v6625_v8  ;;  %v6628_v17 = vpop.f32.mrb[2].mxu1  ;;  %v1291_v6 = vcombine.high %v1283_v62, %v1283_v62  ;;  %v7643_v8 = vld [vmem:[%s9702_s2 + $0x838] sm:$0xff]  }
  0xfa   :  { %v4643_v15 = vadd.f32 %v6605_v9, %v1071_v4  ;;  %6928 = vmatpush3.bf16.msra.mxu1 %v7603_v1  ;;  %v6629_v19 = vpop.f32.mrb[3].mxu1  ;;  %v8889_v9 = vrot.slane %v1276_v63, %v8060_v42  ;;  %v7644_v11 = vld [vmem:[%s9702_s2 + $0x8b8] sm:$0xff]   ;;  %v7646_v17 = vld [vmem:[%s9702_s2 + $0x9c0] sm:$0xff]  }
  0xfb   :  { %6929 = vmatprep.subr.bf16.mxu1 %v7605_v5  ;;  %v7642_v5 = vld [vmem:[%s9702_s2 + $0x8f8] sm:$0xff]   ;;  %v1313_v12 = vrot.slane %v1291_v6, %v8060_v42  ;;  %v7682_v6 = vld [vmem:[%s9702_s2 + $0xa48] sm:$0xff]  }
  0xfc   :  { %v8783_v21 = vadd.f32 %v6627_v16, %v4643_v15  ;;  %6908 = vmatpush3.bf16.msra.mxu0 %v7606_v7  ;;  %v1292_v15 = vcombine.high %v8889_v9, %v8889_v9 }
  0xfd   :  { %6909 = vmatprep.subr.bf16.mxu0 %v7608_v14  ;;  %v7645_v14 = vld [vmem:[%s9702_s2 + $0x940] sm:$0xff]   ;;  %v1323_v16 = vcombine.high %v1313_v12, %v1313_v12 }
  0xfe   :  { %6930 = vmatpush3.bf16.msra.mxu1 %v7607_v13  ;;  %v1299_v13 = vrot.slane %v1283_v62, %v8060_v42  ;;  %v1320_v19 = vrot.slane %v1292_v15, %v8060_v42  ;;  %v7675_v62 = vld [vmem:[%s9702_s2 + $0x938] sm:$0xff]   ;;  %v7689_v15 = vld [vmem:[%s9702_s2 + $0xa90] sm:$0xff]  }
  0xff   :  { %6931 = vmatprep.subr.bf16.mxu1 %v7609_v18  ;;  %v7647_v18 = vld [vmem:[%s9702_s2 + $0x900] sm:$0xff]  }
 0x100   :  { %6910 = vmatpush3.bf16.msra.mxu0 %v7610_v20  ;;  %v7648_v20 = vld [vmem:[%s9702_s2 + $0x980] sm:$0xff]  }
 0x101   :  { %6939 = vmatprep.subr.bf16.mxu0 %v7613_v25  ;;  %v1324_v25 = vcombine.high %v1320_v19, %v1320_v19 }
 0x102   :  { %6932 = vmatpush3.bf16.msra.mxu1 %v7611_v22  ;;  %v7649_v22 = vld [vmem:[%s9702_s2 + $0x948] sm:$0xff]  }
 0x103   :  { %5201 = vmatmul.mubr.bf16.vlgmr.msra.gmra.mrb[28].mxu0 %v1257_v23  ;;  %6961 = vmatprep.subr.bf16.mxu1 %v7614_v26  ;;  %v7650_v23 = vld [vmem:[%s9702_s2 + $0x9c8] sm:$0xff]  }
 0x104   :  { %6940 = vmatpush3.bf16.msra.mxu0 %v7615_v27  ;;  %5280 = vmatprep.mubr.bf16.mxu0 %v1313_v12  ;;  %v7651_v26 = vld [vmem:[%s9702_s2 + $0x908] sm:$0xff]   ;;  %v7687_v12 = vld [vmem:[%s9702_s2 + $0xad0] sm:$0xff]  }
 0x105   :  { %5241 = vmatmul.mubr.bf16.vlgmr.msra.gmra.mrb[28].mxu1 %v1273_v24  ;;  %6941 = vmatprep.subr.bf16.mxu0 %v7617_v29  ;;  %v7652_v27 = vld [vmem:[%s9702_s2 + $0x988] sm:$0xff]   ;;  %v7654_v24 = vld [vmem:[%s9702_s2 + $0x9d0] sm:$0xff]  }
 0x106   :  { %6962 = vmatpush3.bf16.msra.mxu1 %v7616_v28  ;;  %5320 = vmatprep.mubr.bf16.mxu1 %v1323_v16  ;;  %v7653_v28 = vld [vmem:[%s9702_s2 + $0x950] sm:$0xff]   ;;  %v7691_v16 = vld [vmem:[%s9702_s2 + $0xad8] sm:$0xff]  }
 0x107   :  { %6963 = vmatprep.subr.bf16.mxu1 %v7618_v30  ;;  %v7655_v29 = vld [vmem:[%s9702_s2 + $0x910] sm:$0xff]  }
 0x108   :  { %6942 = vmatpush3.bf16.msra.mxu0 %v7619_v31  ;;  %v7656_v30 = vld [vmem:[%s9702_s2 + $0x990] sm:$0xff]   ;;  %v7657_v31 = vld [vmem:[%s9702_s2 + $0x958] sm:$0xff]  }
 0x109   :  { %6943 = vmatprep.subr.bf16.mxu0 %v7621_v33  ;;  %v7659_v33 = vld [vmem:[%s9702_s2 + $0x918] sm:$0xff]  }
 0x10a   :  { %6964 = vmatpush3.bf16.msra.mxu1 %v7620_v32  ;;  %v7658_v32 = vld [vmem:[%s9702_s2 + $0x9d8] sm:$0xff]  }
 0x10b   :  { %6965 = vmatprep.subr.bf16.mxu1 %v7622_v35  ;;  %v7660_v35 = vld [vmem:[%s9702_s2 + $0x998] sm:$0xff]  }
 0x10c   :  { %6944 = vmatpush3.bf16.msra.mxu0 %v7623_v36  ;;  %v7661_v36 = vld [vmem:[%s9702_s2 + $0x960] sm:$0xff]  }
 0x10d   :  { %6945 = vmatprep.subr.bf16.mxu0 %v7625_v38  ;;  %v7663_v38 = vld [vmem:[%s9702_s2 + $0x920] sm:$0xff]  }
 0x10e   :  { %6966 = vmatpush3.bf16.msra.mxu1 %v7624_v37  ;;  %v7662_v37 = vld [vmem:[%s9702_s2 + $0x9e0] sm:$0xff]  }
 0x10f   :  { %6967 = vmatprep.subr.bf16.mxu1 %v7626_v39  ;;  %v7664_v39 = vld [vmem:[%s9702_s2 + $0x9a0] sm:$0xff]  }
 0x110   :  { %6946 = vmatpush3.bf16.msra.mxu0 %v7627_v40  ;;  %v7665_v40 = vld [vmem:[%s9702_s2 + $0x968] sm:$0xff]  }
 0x111   :  { %6947 = vmatprep.subr.bf16.mxu0 %v7629_v43  ;;  %v7667_v43 = vld [vmem:[%s9702_s2 + $0x928] sm:$0xff]  }
 0x112   :  { %6968 = vmatpush3.bf16.msra.mxu1 %v7628_v41  ;;  %v7666_v41 = vld [vmem:[%s9702_s2 + $0x9e8] sm:$0xff]  }
 0x113   :  { %6969 = vmatprep.subr.bf16.mxu1 %v7630_v44  ;;  %v7668_v44 = vld [vmem:[%s9702_s2 + $0x9a8] sm:$0xff]  }
 0x114   :  { %6948 = vmatpush3.bf16.msra.mxu0 %v7631_v45  ;;  %v7669_v45 = vld [vmem:[%s9702_s2 + $0x970] sm:$0xff]  }
 0x115   :  { %6949 = vmatprep.subr.bf16.mxu0 %v7633_v47  ;;  %v7670_v47 = vld [vmem:[%s9702_s2 + $0x9f0] sm:$0xff]  }
 0x116   :  { %6970 = vmatpush3.bf16.msra.mxu1 %v7632_v46  ;;  %v6647_v52 = vpop.f32.mrb[4].mxu0 }
 0x117   :  { %v6648_v54 = vpop.f32.mrb[5].mxu0  ;;  %6971 = vmatprep.subr.bf16.mxu1 %v7634_v48  ;;  %v6669_v57 = vpop.f32.mrb[4].mxu1 }
 0x118   :  { %v6649_v58 = vadd.f32 %v6648_v54, %v6647_v52  ;;  %v6650_v59 = vpop.f32.mrb[6].mxu0  ;;  %6950 = vmatpush3.bf16.msra.mxu0 %v7635_v49  ;;  %v6670_v0 = vpop.f32.mrb[5].mxu1  ;;  %v7671_v49 = vld [vmem:[%s9702_s2 + $0x930] sm:$0xff]  }
 0x119   :  { %v6651_v1 = vpop.f32.mrb[7].mxu0  ;;  %6951 = vmatprep.subr.bf16.mxu0 %v7637_v51  ;;  %v6671_v3 = vadd.f32 %v6670_v0, %v6669_v57  ;;  %v6672_v4 = vpop.f32.mrb[6].mxu1  ;;  %v1306_v0 = vrot.slane %v8889_v9, %v8060_v42  ;;  %v7684_v9 = vld [vmem:[%s9702_s2 + $0xa08] sm:$0xff]  }
 0x11a   :  { %v4723_v2 = vadd.f32 %v6649_v58, %v8783_v21  ;;  %6972 = vmatpush3.bf16.msra.mxu1 %v7636_v50  ;;  %v6673_v7 = vpop.f32.mrb[7].mxu1  ;;  %v1321_v21 = vcombine.high %v1299_v13, %v1299_v13  ;;  %v7678_v1 = vld [vmem:[%s9702_s2 + $0xa40] sm:$0xff]  }
 0x11b   :  { %6973 = vmatprep.subr.bf16.mxu1 %v7638_v53  ;;  %v7680_v4 = vld [vmem:[%s9702_s2 + $0xa00] sm:$0xff]  }
 0x11c   :  { %v8891_v10 = vadd.f32 %v6671_v3, %v4723_v2  ;;  %6952 = vmatpush3.bf16.msra.mxu0 %v7639_v55  ;;  %v7672_v55 = vld [vmem:[%s9702_s2 + $0x9b0] sm:$0xff]   ;;  %v7676_v2 = vld [vmem:[%s9702_s2 + $0x9b8] sm:$0xff]   ;;  %v7679_v3 = vld [vmem:[%s9702_s2 + $0xac0] sm:$0xff]  }
 0x11d   :  { %6953 = vmatprep.subr.bf16.mxu0 %v7641_v61  ;;  %v7681_v7 = vld [vmem:[%s9702_s2 + $0xa80] sm:$0xff]  }
 0x11e   :  { %6974 = vmatpush3.bf16.msra.mxu1 %v7640_v60  ;;  %v7674_v60 = vld [vmem:[%s9702_s2 + $0x9f8] sm:$0xff]  }
 0x11f   :  { %6975 = vmatprep.subr.bf16.mxu1 %v7642_v5  ;;  %v1322_v5 = vcombine.high %v1306_v0, %v1306_v0 }
 0x120   :  { %6954 = vmatpush3.bf16.msra.mxu0 %v7643_v8  ;;  %v7683_v8 = vld [vmem:[%s9702_s2 + $0xac8] sm:$0xff]  }
 0x121   :  { %6983 = vmatprep.subr.bf16.mxu0 %v7645_v14  ;;  %v7690_v14 = vld [vmem:[%s9702_s2 + $0xa58] sm:$0xff]  }
 0x122   :  { %6976 = vmatpush3.bf16.msra.mxu1 %v7644_v11  ;;  %v7685_v11 = vld [vmem:[%s9702_s2 + $0xa88] sm:$0xff]  }
 0x123   :  { %5281 = vmatmul.mubr.bf16.vlgmr.msra.gmra.mrb[32].mxu0 %v1299_v13  ;;  %7005 = vmatprep.subr.bf16.mxu1 %v7646_v17  ;;  %v7688_v13 = vld [vmem:[%s9702_s2 + $0xa10] sm:$0xff]   ;;  %v7692_v17 = vld [vmem:[%s9702_s2 + $0xa18] sm:$0xff]  }
 0x124   :  { %6984 = vmatpush3.bf16.msra.mxu0 %v7647_v18  ;;  %5360 = vmatprep.mubr.bf16.mxu0 %v1320_v19  ;;  %v7694_v18 = vld [vmem:[%s9702_s2 + $0xa60] sm:$0xff]   ;;  %v7693_v19 = vld [vmem:[%s9702_s2 + $0xa98] sm:$0xff]  }
 0x125   :  { %5321 = vmatmul.mubr.bf16.vlgmr.msra.gmra.mrb[32].mxu1 %v1321_v21  ;;  %6985 = vmatprep.subr.bf16.mxu0 %v7649_v22  ;;  %v7696_v21 = vld [vmem:[%s9702_s2 + $0xa20] sm:$0xff]   ;;  %v7698_v22 = vld [vmem:[%s9702_s2 + $0xa68] sm:$0xff]  }
 0x126   :  { %7006 = vmatpush3.bf16.msra.mxu1 %v7648_v20  ;;  %5400 = vmatprep.mubr.bf16.mxu1 %v1324_v25  ;;  %v7695_v20 = vld [vmem:[%s9702_s2 + $0xae0] sm:$0xff]   ;;  %v7699_v25 = vld [vmem:[%s9702_s2 + $0xae8] sm:$0xff]  }
 0x127   :  { %7007 = vmatprep.subr.bf16.mxu1 %v7650_v23  ;;  %v7697_v23 = vld [vmem:[%s9702_s2 + $0xaa0] sm:$0xff]  }
 0x128   :  { %6986 = vmatpush3.bf16.msra.mxu0 %v7651_v26  ;;  %v7700_v26 = vld [vmem:[%s9702_s2 + $0xa28] sm:$0xff]  }
 0x129   :  { %6987 = vmatprep.subr.bf16.mxu0 %v7653_v28 }
 0x12a   :  { %7008 = vmatpush3.bf16.msra.mxu1 %v7652_v27  ;;  %v7702_v27 = vld [vmem:[%s9702_s2 + $0xa70] sm:$0xff]  }
 0x12b   :  { %7009 = vmatprep.subr.bf16.mxu1 %v7654_v24  ;;  %v7701_v24 = vld [vmem:[%s9702_s2 + $0xaa8] sm:$0xff]  }
 0x12c   :  { %6988 = vmatpush3.bf16.msra.mxu0 %v7655_v29 }
 0x12d   :  { %6989 = vmatprep.subr.bf16.mxu0 %v7657_v31 }
 0x12e   :  { %7010 = vmatpush3.bf16.msra.mxu1 %v7656_v30  ;;  %v7703_v30 = vld [vmem:[%s9702_s2 + $0xaf0] sm:$0xff]  }
 0x12f   :  { %7011 = vmatprep.subr.bf16.mxu1 %v7658_v32 }
 0x130   :  { %6990 = vmatpush3.bf16.msra.mxu0 %v7659_v33 }
 0x131   :  { %6991 = vmatprep.subr.bf16.mxu0 %v7661_v36  ;;  %v33_v36 = vld [vmem:[%s9700_s0 + $0x28] sm:$0xff] }
 0x132   :  { %7012 = vmatpush3.bf16.msra.mxu1 %v7660_v35  ;;  %v7704_v35 = vld [vmem:[%s9702_s2 + $0xa30] sm:$0xff]  }
 0x133   :  { %7013 = vmatprep.subr.bf16.mxu1 %v7662_v37 }
 0x134   :  { %6992 = vmatpush3.bf16.msra.mxu0 %v7663_v38 }
 0x135   :  { %6993 = vmatprep.subr.bf16.mxu0 %v7665_v40  ;;  %v7706_v40 = vld [vmem:[%s9702_s2 + $0xa78] sm:$0xff]  }
 0x136   :  { %7014 = vmatpush3.bf16.msra.mxu1 %v7664_v39  ;;  %v6691_v46 = vpop.f32.mrb[8].mxu0  ;;  %v7705_v39 = vld [vmem:[%s9702_s2 + $0xab0] sm:$0xff]  }
 0x137   :  { %v6692_v48 = vpop.f32.mrb[9].mxu0  ;;  %7015 = vmatprep.subr.bf16.mxu1 %v7666_v41  ;;  %v1332_v41 = vrot.slane %v33_v36, %v8060_v42 }
 0x138   :  { %v6713_v50 = vpop.f32.mrb[8].mxu1  ;;  %v6693_v51 = vadd.f32 %v6692_v48, %v6691_v46  ;;  %v6694_v52 = vpop.f32.mrb[10].mxu0  ;;  %6994 = vmatpush3.bf16.msra.mxu0 %v7667_v43  ;;  %v1325_v43 = vcombine.high %v33_v36, %v33_v36 }
 0x139   :  { %v6714_v53 = vpop.f32.mrb[9].mxu1  ;;  %v6695_v54 = vpop.f32.mrb[11].mxu0  ;;  %6995 = vmatprep.subr.bf16.mxu0 %v7669_v45 }
 0x13a   :  { %v4803_v57 = vadd.f32 %v6693_v51, %v8891_v10  ;;  %v6715_v58 = vadd.f32 %v6714_v53, %v6713_v50  ;;  %v6716_v59 = vpop.f32.mrb[10].mxu1  ;;  %7016 = vmatpush3.bf16.msra.mxu1 %v7668_v44  ;;  %v7686_v10 = vld [vmem:[%s9702_s2 + $0xa50] sm:$0xff]   ;;  %v1340_v50 = vcombine.high %v1332_v41, %v1332_v41  ;;  %v9101_v51 = vrot.slane %v1325_v43, %v8060_v42  ;;  %v7709_v53 = vld [vmem:[%s9702_s2 + $0xab8] sm:$0xff]  }
 0x13b   :  { %v6717_v61 = vpop.f32.mrb[11].mxu1  ;;  %7017 = vmatprep.subr.bf16.mxu1 %v7670_v47  ;;  %v7707_v47 = vld [vmem:[%s9702_s2 + $0xaf8] sm:$0xff]  }
 0x13c   :  { %v8995_v63 = vadd.f32 %v6715_v58, %v4803_v57  ;;  %6996 = vmatpush3.bf16.msra.mxu0 %v7671_v49  ;;  %v7708_v49 = vld [vmem:[%s9702_s2 + $0xa38] sm:$0xff]   ;;  %v1362_v54 = vrot.slane %v1340_v50, %v8060_v42  ;;  %v1341_v57 = vcombine.high %v9101_v51, %v9101_v51  ;;  %v7711_v58 = vld [vmem:[%s9702_s2 + $0xbc0] sm:$0xff]   ;;  %v1355_v43 = vrot.slane %v9101_v51, %v8060_v42  ;;  %v7748_v50 = vld [vmem:[%s9702_s2 + $0xcc8] sm:$0xff]  }
 0x13d   :  { %6997 = vmatprep.subr.bf16.mxu0 %v7673_v56  ;;  %v7710_v56 = vld [vmem:[%s9702_s2 + $0xb40] sm:$0xff]   ;;  %v7749_v51 = vld [vmem:[%s9702_s2 + $0xc08] sm:$0xff]  }
 0x13e   :  { %7018 = vmatpush3.bf16.msra.mxu1 %v7672_v55  ;;  %v1348_v55 = vrot.slane %v1332_v41, %v8060_v42  ;;  %v1372_v59 = vcombine.high %v1362_v54, %v1362_v54  ;;  %v1369_v61 = vrot.slane %v1341_v57, %v8060_v42  ;;  %v7741_v41 = vld [vmem:[%s9702_s2 + $0xbb8] sm:$0xff]  }
 0x13f   :  { %7019 = vmatprep.subr.bf16.mxu1 %v7674_v60  ;;  %v7712_v60 = vld [vmem:[%s9702_s2 + $0xb00] sm:$0xff]   ;;  %v7755_v57 = vld [vmem:[%s9702_s2 + $0xc58] sm:$0xff]  }
 0x140   :  { %6998 = vmatpush3.bf16.msra.mxu0 %v7675_v62  ;;  %v7713_v62 = vld [vmem:[%s9702_s2 + $0xb80] sm:$0xff]  }
 0x141   :  { %7027 = vmatprep.subr.bf16.mxu0 %v7678_v1  ;;  %v7715_v1 = vld [vmem:[%s9702_s2 + $0xbc8] sm:$0xff]  }
 0x142   :  { %7020 = vmatpush3.bf16.msra.mxu1 %v7676_v2  ;;  %v1373_v2 = vcombine.high %v1369_v61, %v1369_v61 }
 0x143   :  { %5361 = vmatmul.mubr.bf16.vlgmr.msra.gmra.mrb[36].mxu0 %v1306_v0  ;;  %7049 = vmatprep.subr.bf16.mxu1 %v7679_v3  ;;  %v7714_v0 = vld [vmem:[%s9702_s2 + $0xb48] sm:$0xff]  }
 0x144   :  { %7028 = vmatpush3.bf16.msra.mxu0 %v7680_v4  ;;  %5440 = vmatprep.mubr.bf16.mxu0 %v1362_v54  ;;  %v7716_v3 = vld [vmem:[%s9702_s2 + $0xb08] sm:$0xff]   ;;  %v7752_v54 = vld [vmem:[%s9702_s2 + $0xcd0] sm:$0xff]  }
 0x145   :  { %5401 = vmatmul.mubr.bf16.vlgmr.msra.gmra.mrb[36].mxu1 %v1322_v5  ;;  %7029 = vmatprep.subr.bf16.mxu0 %v7682_v6  ;;  %v7717_v4 = vld [vmem:[%s9702_s2 + $0xb88] sm:$0xff]   ;;  %v7718_v5 = vld [vmem:[%s9702_s2 + $0xb50] sm:$0xff]  }
 0x146   :  { %7050 = vmatpush3.bf16.msra.mxu1 %v7681_v7  ;;  %5480 = vmatprep.mubr.bf16.mxu1 %v1372_v59  ;;  %v7719_v6 = vld [vmem:[%s9702_s2 + $0xbd0] sm:$0xff]   ;;  %v7757_v59 = vld [vmem:[%s9702_s2 + $0xc18] sm:$0xff]  }
 0x147   :  { %7051 = vmatprep.subr.bf16.mxu1 %v7683_v8  ;;  %v7720_v7 = vld [vmem:[%s9702_s2 + $0xb10] sm:$0xff]  }
 0x148   :  { %7030 = vmatpush3.bf16.msra.mxu0 %v7684_v9  ;;  %v7721_v8 = vld [vmem:[%s9702_s2 + $0xb90] sm:$0xff]   ;;  %v7722_v9 = vld [vmem:[%s9702_s2 + $0xb58] sm:$0xff]  }
 0x149   :  { %7031 = vmatprep.subr.bf16.mxu0 %v7686_v10  ;;  %v7723_v10 = vld [vmem:[%s9702_s2 + $0xbd8] sm:$0xff]  }
 0x14a   :  { %7052 = vmatpush3.bf16.msra.mxu1 %v7685_v11  ;;  %v7724_v11 = vld [vmem:[%s9702_s2 + $0xb18] sm:$0xff]  }
 0x14b   :  { %7053 = vmatprep.subr.bf16.mxu1 %v7687_v12  ;;  %v7725_v12 = vld [vmem:[%s9702_s2 + $0xb98] sm:$0xff]  }
 0x14c   :  { %7032 = vmatpush3.bf16.msra.mxu0 %v7688_v13  ;;  %v7726_v13 = vld [vmem:[%s9702_s2 + $0xb60] sm:$0xff]  }
 0x14d   :  { %7033 = vmatprep.subr.bf16.mxu0 %v7690_v14  ;;  %v7727_v14 = vld [vmem:[%s9702_s2 + $0xbe0] sm:$0xff]  }
 0x14e   :  { %7054 = vmatpush3.bf16.msra.mxu1 %v7689_v15  ;;  %v7728_v15 = vld [vmem:[%s9702_s2 + $0xb20] sm:$0xff]  }
 0x14f   :  { %7055 = vmatprep.subr.bf16.mxu1 %v7691_v16  ;;  %v7729_v16 = vld [vmem:[%s9702_s2 + $0xba0] sm:$0xff]  }
 0x150   :  { %7034 = vmatpush3.bf16.msra.mxu0 %v7692_v17  ;;  %v7730_v17 = vld [vmem:[%s9702_s2 + $0xb68] sm:$0xff]  }
 0x151   :  { %7035 = vmatprep.subr.bf16.mxu0 %v7694_v18  ;;  %v7731_v18 = vld [vmem:[%s9702_s2 + $0xbe8] sm:$0xff]  }
 0x152   :  { %7056 = vmatpush3.bf16.msra.mxu1 %v7693_v19  ;;  %v7732_v19 = vld [vmem:[%s9702_s2 + $0xb28] sm:$0xff]  }
 0x153   :  { %7057 = vmatprep.subr.bf16.mxu1 %v7695_v20  ;;  %v7733_v20 = vld [vmem:[%s9702_s2 + $0xba8] sm:$0xff]  }
 0x154   :  { %7036 = vmatpush3.bf16.msra.mxu0 %v7696_v21  ;;  %v7734_v21 = vld [vmem:[%s9702_s2 + $0xb70] sm:$0xff]  }
 0x155   :  { %7037 = vmatprep.subr.bf16.mxu0 %v7698_v22 }
 0x156   :  { %7058 = vmatpush3.bf16.msra.mxu1 %v7697_v23  ;;  %v6735_v28 = vpop.f32.mrb[12].mxu0  ;;  %v7735_v23 = vld [vmem:[%s9702_s2 + $0xbf0] sm:$0xff]  }
 0x157   :  { %v6736_v29 = vpop.f32.mrb[13].mxu0  ;;  %7059 = vmatprep.subr.bf16.mxu1 %v7699_v25 }
 0x158   :  { %v6757_v31 = vpop.f32.mrb[12].mxu1  ;;  %v6737_v32 = vadd.f32 %v6736_v29, %v6735_v28  ;;  %v6738_v33 = vpop.f32.mrb[14].mxu0  ;;  %7038 = vmatpush3.bf16.msra.mxu0 %v7700_v26  ;;  %v7736_v26 = vld [vmem:[%s9702_s2 + $0xb30] sm:$0xff]  }
 0x159   :  { %v6758_v37 = vpop.f32.mrb[13].mxu1  ;;  %v6739_v38 = vpop.f32.mrb[15].mxu0  ;;  %7039 = vmatprep.subr.bf16.mxu0 %v7702_v27  ;;  %v7737_v29 = vld [vmem:[%s9702_s2 + $0xbb0] sm:$0xff]  }
 0x15a   :  { %v4883_v44 = vadd.f32 %v6737_v32, %v8995_v63  ;;  %v6759_v45 = vadd.f32 %v6758_v37, %v6757_v31  ;;  %v6760_v46 = vpop.f32.mrb[14].mxu1  ;;  %7060 = vmatpush3.bf16.msra.mxu1 %v7701_v24  ;;  %v1370_v63 = vcombine.high %v1348_v55, %v1348_v55  ;;  %v7739_v37 = vld [vmem:[%s9702_s2 + $0xbf8] sm:$0xff]  }
 0x15b   :  { %v6761_v48 = vpop.f32.mrb[15].mxu1  ;;  %7061 = vmatprep.subr.bf16.mxu1 %v7703_v30  ;;  %v7738_v30 = vld [vmem:[%s9702_s2 + $0xb78] sm:$0xff]   ;;  %v7745_v46 = vld [vmem:[%s9702_s2 + $0xc00] sm:$0xff]  }
 0x15c   :  { %v9103_v52 = vadd.f32 %v6759_v45, %v4883_v44  ;;  %7040 = vmatpush3.bf16.msra.mxu0 %v7704_v35  ;;  %v7743_v44 = vld [vmem:[%s9702_s2 + $0xc40] sm:$0xff]   ;;  %v1371_v48 = vcombine.high %v1355_v43, %v1355_v43 }
 0x15d   :  { %7041 = vmatprep.subr.bf16.mxu0 %v7706_v40  ;;  %v7744_v45 = vld [vmem:[%s9702_s2 + $0xcc0] sm:$0xff]  }
 0x15e   :  { %7062 = vmatpush3.bf16.msra.mxu1 %v7705_v39  ;;  %v7740_v39 = vld [vmem:[%s9702_s2 + $0xb38] sm:$0xff]  }
 0x15f   :  { %7063 = vmatprep.subr.bf16.mxu1 %v7707_v47  ;;  %v7746_v47 = vld [vmem:[%s9702_s2 + $0xc80] sm:$0xff]  }
 0x160   :  { %7042 = vmatpush3.bf16.msra.mxu0 %v7708_v49  ;;  %v7747_v49 = vld [vmem:[%s9702_s2 + $0xc48] sm:$0xff]  }
 0x161   :  { %7071 = vmatprep.subr.bf16.mxu0 %v7710_v56  ;;  %v7754_v56 = vld [vmem:[%s9702_s2 + $0xc90] sm:$0xff]  }
 0x162   :  { %7064 = vmatpush3.bf16.msra.mxu1 %v7709_v53  ;;  %v7751_v53 = vld [vmem:[%s9702_s2 + $0xc50] sm:$0xff]  }
 0x163   :  { %5441 = vmatmul.mubr.bf16.vlgmr.msra.gmra.mrb[40].mxu0 %v1348_v55  ;;  %7093 = vmatprep.subr.bf16.mxu1 %v7711_v58  ;;  %v7753_v55 = vld [vmem:[%s9702_s2 + $0xc10] sm:$0xff]   ;;  %v7756_v58 = vld [vmem:[%s9702_s2 + $0xcd8] sm:$0xff]  }
 0x164   :  { %7072 = vmatpush3.bf16.msra.mxu0 %v7712_v60  ;;  %5520 = vmatprep.mubr.bf16.mxu0 %v1369_v61  ;;  %v7758_v60 = vld [vmem:[%s9702_s2 + $0xc98] sm:$0xff]   ;;  %v7759_v61 = vld [vmem:[%s9702_s2 + $0xc60] sm:$0xff]  }
 0x165   :  { %5481 = vmatmul.mubr.bf16.vlgmr.msra.gmra.mrb[40].mxu1 %v1370_v63  ;;  %7073 = vmatprep.subr.bf16.mxu0 %v7714_v0  ;;  %v7761_v63 = vld [vmem:[%s9702_s2 + $0xc20] sm:$0xff]  }
 0x166   :  { %7094 = vmatpush3.bf16.msra.mxu1 %v7713_v62  ;;  %5560 = vmatprep.mubr.bf16.mxu1 %v1373_v2  ;;  %v7760_v62 = vld [vmem:[%s9702_s2 + $0xce0] sm:$0xff]   ;;  %v7764_v2 = vld [vmem:[%s9702_s2 + $0xce8] sm:$0xff]  }
 0x167   :  { %7095 = vmatprep.subr.bf16.mxu1 %v7715_v1  ;;  %v7762_v0 = vld [vmem:[%s9702_s2 + $0xca0] sm:$0xff]   ;;  %v7763_v1 = vld [vmem:[%s9702_s2 + $0xc68] sm:$0xff]  }
 0x168   :  { %7074 = vmatpush3.bf16.msra.mxu0 %v7716_v3  ;;  %v7765_v3 = vld [vmem:[%s9702_s2 + $0xc28] sm:$0xff]  }
 0x169   :  { %7075 = vmatprep.subr.bf16.mxu0 %v7718_v5  ;;  %v7767_v5 = vld [vmem:[%s9702_s2 + $0xc70] sm:$0xff]  }
 0x16a   :  { %7096 = vmatpush3.bf16.msra.mxu1 %v7717_v4  ;;  %v7766_v4 = vld [vmem:[%s9702_s2 + $0xca8] sm:$0xff]  }
 0x16b   :  { %7097 = vmatprep.subr.bf16.mxu1 %v7719_v6 }
 0x16c   :  { %7076 = vmatpush3.bf16.msra.mxu0 %v7720_v7  ;;  %v7768_v7 = vld [vmem:[%s9702_s2 + $0xcf0] sm:$0xff]  }
 0x16d   :  { %7077 = vmatprep.subr.bf16.mxu0 %v7722_v9  ;;  %v7769_v9 = vld [vmem:[%s9702_s2 + $0xc30] sm:$0xff]  }
 0x16e   :  { %7098 = vmatpush3.bf16.msra.mxu1 %v7721_v8 }
 0x16f   :  { %7099 = vmatprep.subr.bf16.mxu1 %v7723_v10 }
 0x170   :  { %7078 = vmatpush3.bf16.msra.mxu0 %v7724_v11 }
 0x171   :  { %7079 = vmatprep.subr.bf16.mxu0 %v7726_v13  ;;  %v7770_v13 = vld [vmem:[%s9702_s2 + $0xcb0] sm:$0xff]  }
 0x172   :  { %7100 = vmatpush3.bf16.msra.mxu1 %v7725_v12 }
 0x173   :  { %7101 = vmatprep.subr.bf16.mxu1 %v7727_v14 }
 0x174   :  { %7080 = vmatpush3.bf16.msra.mxu0 %v7728_v15 }
 0x175   :  { %7081 = vmatprep.subr.bf16.mxu0 %v7730_v17  ;;  %v34_v17 = vld [vmem:[%s9700_s0 + $0x30] sm:$0xff] }
 0x176   :  { %7102 = vmatpush3.bf16.msra.mxu1 %v7729_v16  ;;  %v6779_v22 = vpop.f32.mrb[16].mxu0  ;;  %v7771_v16 = vld [vmem:[%s9702_s2 + $0xc78] sm:$0xff]  }
 0x177   :  { %v6780_v25 = vpop.f32.mrb[17].mxu0  ;;  %7103 = vmatprep.subr.bf16.mxu1 %v7731_v18 }
 0x178   :  { %v6801_v27 = vpop.f32.mrb[16].mxu1  ;;  %v6781_v28 = vadd.f32 %v6780_v25, %v6779_v22  ;;  %v6782_v24 = vpop.f32.mrb[18].mxu0  ;;  %7082 = vmatpush3.bf16.msra.mxu0 %v7732_v19  ;;  %v1381_v22 = vrot.slane %v34_v17, %v8060_v42 }
 0x179   :  { %v6802_v31 = vpop.f32.mrb[17].mxu1  ;;  %v6783_v32 = vpop.f32.mrb[19].mxu0  ;;  %7083 = vmatprep.subr.bf16.mxu0 %v7734_v21  ;;  %v7772_v21 = vld [vmem:[%s9702_s2 + $0xcf8] sm:$0xff]  }
 0x17a   :  { %v4963_v33 = vadd.f32 %v6781_v28, %v9103_v52  ;;  %v6803_v35 = vadd.f32 %v6802_v31, %v6801_v27  ;;  %v6804_v36 = vpop.f32.mrb[18].mxu1  ;;  %7104 = vmatpush3.bf16.msra.mxu1 %v7733_v20  ;;  %v7750_v52 = vld [vmem:[%s9702_s2 + $0xc88] sm:$0xff]   ;;  %v7774_v28 = vld [vmem:[%s9702_s2 + $0xcb8] sm:$0xff]   ;;  %v1389_v24 = vcombine.high %v1381_v22, %v1381_v22  ;;  %v7775_v31 = vld [vmem:[%s9702_s2 + $0xd40] sm:$0xff]  }
 0x17b   :  { %v6805_v38 = vpop.f32.mrb[19].mxu1  ;;  %7105 = vmatprep.subr.bf16.mxu1 %v7735_v23  ;;  %v1374_v23 = vcombine.high %v34_v17, %v34_v17  ;;  %v7777_v36 = vld [vmem:[%s9702_s2 + $0xd00] sm:$0xff]  }
 0x17c   :  { %v9207_v40 = vadd.f32 %v6803_v35, %v4963_v33  ;;  %7084 = vmatpush3.bf16.msra.mxu0 %v7736_v26  ;;  %v7773_v26 = vld [vmem:[%s9702_s2 + $0xc38] sm:$0xff]   ;;  %v1411_v32 = vrot.slane %v1389_v24, %v8060_v42  ;;  %v7776_v33 = vld [vmem:[%s9702_s2 + $0xdc0] sm:$0xff]   ;;  %v7813_v24 = vld [vmem:[%s9702_s2 + $0xec8] sm:$0xff]  }
 0x17d   :  { %7085 = vmatprep.subr.bf16.mxu0 %v7738_v30  ;;  %v1397_v30 = vrot.slane %v1381_v22, %v8060_v42  ;;  %v7778_v38 = vld [vmem:[%s9702_s2 + $0xd80] sm:$0xff]  }
 0x17e   :  { %7106 = vmatpush3.bf16.msra.mxu1 %v7737_v29  ;;  %v9318_v29 = vrot.slane %v1374_v23, %v8060_v42  ;;  %v7809_v22 = vld [vmem:[%s9702_s2 + $0xec0] sm:$0xff]  }
 0x17f   :  { %7107 = vmatprep.subr.bf16.mxu1 %v7739_v37  ;;  %v1421_v37 = vcombine.high %v1411_v32, %v1411_v32  ;;  %v9435_v23 = vld [vmem:[%s9701_s1] sm:$0x3] }
 0x180   :  { %7086 = vmatpush3.bf16.msra.mxu0 %v7740_v39  ;;  %v1390_v35 = vcombine.high %v9318_v29, %v9318_v29 }
 0x181   :  { %7115 = vmatprep.subr.bf16.mxu0 %v7743_v44 }
 0x182   :  { %7108 = vmatpush3.bf16.msra.mxu1 %v7741_v41  ;;  %v1418_v39 = vrot.slane %v1390_v35, %v8060_v42  ;;  %v7779_v41 = vld [vmem:[%s9702_s2 + $0xd48] sm:$0xff]   ;;  %v7819_v35 = vld [vmem:[%s9702_s2 + $0xe90] sm:$0xff]  }
 0x183   :  { %5521 = vmatmul.mubr.bf16.vlgmr.msra.gmra.mrb[44].mxu0 %v1355_v43  ;;  %7137 = vmatprep.subr.bf16.mxu1 %v7744_v45  ;;  %v7780_v43 = vld [vmem:[%s9702_s2 + $0xdc8] sm:$0xff]  }
 0x184   :  { %7116 = vmatpush3.bf16.msra.mxu0 %v7745_v46  ;;  %5600 = vmatprep.mubr.bf16.mxu0 %v1411_v32  ;;  %v1422_v44 = vcombine.high %v1418_v39, %v1418_v39  ;;  %v7781_v45 = vld [vmem:[%s9702_s2 + $0xd08] sm:$0xff]   ;;  %v7817_v32 = vld [vmem:[%s9702_s2 + $0xed0] sm:$0xff]  }
 0x185   :  { %5561 = vmatmul.mubr.bf16.vlgmr.msra.gmra.mrb[44].mxu1 %v1371_v48  ;;  %7117 = vmatprep.subr.bf16.mxu0 %v7747_v49  ;;  %v7782_v46 = vld [vmem:[%s9702_s2 + $0xd88] sm:$0xff]   ;;  %v7784_v48 = vld [vmem:[%s9702_s2 + $0xdd0] sm:$0xff]  }
 0x186   :  { %7138 = vmatpush3.bf16.msra.mxu1 %v7746_v47  ;;  %5640 = vmatprep.mubr.bf16.mxu1 %v1421_v37  ;;  %v7783_v47 = vld [vmem:[%s9702_s2 + $0xd50] sm:$0xff]   ;;  %v7821_v37 = vld [vmem:[%s9702_s2 + $0xed8] sm:$0xff]  }
 0x187   :  { %7139 = vmatprep.subr.bf16.mxu1 %v7748_v50  ;;  %v7785_v49 = vld [vmem:[%s9702_s2 + $0xd10] sm:$0xff]  }
 0x188   :  { %7118 = vmatpush3.bf16.msra.mxu0 %v7749_v51  ;;  %v7786_v50 = vld [vmem:[%s9702_s2 + $0xd90] sm:$0xff]   ;;  %v7787_v51 = vld [vmem:[%s9702_s2 + $0xd58] sm:$0xff]  }
 0x189   :  { %7119 = vmatprep.subr.bf16.mxu0 %v7751_v53  ;;  %v7789_v53 = vld [vmem:[%s9702_s2 + $0xd18] sm:$0xff]  }
 0x18a   :  { %7140 = vmatpush3.bf16.msra.mxu1 %v7750_v52  ;;  %v7788_v52 = vld [vmem:[%s9702_s2 + $0xdd8] sm:$0xff]  }
 0x18b   :  { %7141 = vmatprep.subr.bf16.mxu1 %v7752_v54  ;;  %v7790_v54 = vld [vmem:[%s9702_s2 + $0xd98] sm:$0xff]  }
 0x18c   :  { %7120 = vmatpush3.bf16.msra.mxu0 %v7753_v55  ;;  %v7791_v55 = vld [vmem:[%s9702_s2 + $0xd60] sm:$0xff]  }
 0x18d   :  { %7121 = vmatprep.subr.bf16.mxu0 %v7755_v57  ;;  %v7793_v57 = vld [vmem:[%s9702_s2 + $0xd20] sm:$0xff]  }
 0x18e   :  { %7142 = vmatpush3.bf16.msra.mxu1 %v7754_v56  ;;  %v7792_v56 = vld [vmem:[%s9702_s2 + $0xde0] sm:$0xff]  }
 0x18f   :  { %7143 = vmatprep.subr.bf16.mxu1 %v7756_v58  ;;  %v7794_v58 = vld [vmem:[%s9702_s2 + $0xda0] sm:$0xff]  }
 0x190   :  { %7122 = vmatpush3.bf16.msra.mxu0 %v7757_v59  ;;  %v7795_v59 = vld [vmem:[%s9702_s2 + $0xd68] sm:$0xff]  }
 0x191   :  { %7123 = vmatprep.subr.bf16.mxu0 %v7759_v61  ;;  %v7797_v61 = vld [vmem:[%s9702_s2 + $0xd28] sm:$0xff]  }
 0x192   :  { %7144 = vmatpush3.bf16.msra.mxu1 %v7758_v60  ;;  %v7796_v60 = vld [vmem:[%s9702_s2 + $0xde8] sm:$0xff]  }
 0x193   :  { %7145 = vmatprep.subr.bf16.mxu1 %v7760_v62  ;;  %v7798_v62 = vld [vmem:[%s9702_s2 + $0xda8] sm:$0xff]  }
 0x194   :  { %7124 = vmatpush3.bf16.msra.mxu0 %v7761_v63  ;;  %v7799_v63 = vld [vmem:[%s9702_s2 + $0xd70] sm:$0xff]  }
 0x195   :  { %7125 = vmatprep.subr.bf16.mxu0 %v7763_v1  ;;  %v7800_v1 = vld [vmem:[%s9702_s2 + $0xdf0] sm:$0xff]  }
 0x196   :  { %7146 = vmatpush3.bf16.msra.mxu1 %v7762_v0  ;;  %v6823_v6 = vpop.f32.mrb[20].mxu0 }
 0x197   :  { %v6824_v8 = vpop.f32.mrb[21].mxu0  ;;  %7147 = vmatprep.subr.bf16.mxu1 %v7764_v2 }
 0x198   :  { %v6845_v10 = vpop.f32.mrb[20].mxu1  ;;  %v6825_v11 = vadd.f32 %v6824_v8, %v6823_v6  ;;  %v6826_v12 = vpop.f32.mrb[22].mxu0  ;;  %7126 = vmatpush3.bf16.msra.mxu0 %v7765_v3  ;;  %v7801_v3 = vld [vmem:[%s9702_s2 + $0xd30] sm:$0xff]   ;;  %v7803_v8 = vld [vmem:[%s9702_s2 + $0xd78] sm:$0xff]  }
 0x199   :  { %v6846_v14 = vpop.f32.mrb[21].mxu1  ;;  %v6827_v15 = vpop.f32.mrb[23].mxu0  ;;  %7127 = vmatprep.subr.bf16.mxu0 %v7767_v5 }
 0x19a   :  { %v5043_v18 = vadd.f32 %v6825_v11, %v9207_v40  ;;  %v6847_v19 = vadd.f32 %v6846_v14, %v6845_v10  ;;  %v6848_v20 = vpop.f32.mrb[22].mxu1  ;;  %7148 = vmatpush3.bf16.msra.mxu1 %v7766_v4  ;;  %v1419_v40 = vcombine.high %v1397_v30, %v1397_v30  ;;  %v7804_v14 = vld [vmem:[%s9702_s2 + $0xdf8] sm:$0xff]  }
 0x19b   :  { %v6849_v25 = vpop.f32.mrb[23].mxu1  ;;  %7149 = vmatprep.subr.bf16.mxu1 %v7768_v7  ;;  %v7802_v7 = vld [vmem:[%s9702_s2 + $0xdb0] sm:$0xff]   ;;  %v7808_v20 = vld [vmem:[%s9702_s2 + $0xe40] sm:$0xff]  }
 0x19c   :  { %v9312_v27 = vadd.f32 %v6847_v19, %v5043_v18  ;;  %7128 = vmatpush3.bf16.msra.mxu0 %v7769_v9  ;;  %v7806_v18 = vld [vmem:[%s9702_s2 + $0xdb8] sm:$0xff]   ;;  %v1404_v19 = vrot.slane %v9318_v29, %v8060_v42  ;;  %v7810_v25 = vld [vmem:[%s9702_s2 + $0xe00] sm:$0xff]   ;;  %v7814_v29 = vld [vmem:[%s9702_s2 + $0xe08] sm:$0xff]  }
 0x19d   :  { %7129 = vmatprep.subr.bf16.mxu0 %v7771_v16  ;;  %v7805_v16 = vld [vmem:[%s9702_s2 + $0xd38] sm:$0xff]  }
 0x19e   :  { %7150 = vmatpush3.bf16.msra.mxu1 %v7770_v13 }
 0x19f   :  { %7151 = vmatprep.subr.bf16.mxu1 %v7772_v21  ;;  %v7901_v21 = vmov 2  }
 0x1a0   :  { %7130 = vmatpush3.bf16.msra.mxu0 %v7773_v26  ;;  %7346 = vset.pattern.permute.xlu1 %v7901_v21  ;;  %v7811_v26 = vld [vmem:[%s9702_s2 + $0xe80] sm:$0xff]  }
 0x1a1   :  { %7159 = vmatprep.subr.bf16.mxu0 %v7775_v31  ;;  %5899 = vperm.xlu1 %7346, %v9435_v23   ;;  %v7816_v31 = vld [vmem:[%s9702_s2 + $0xe50] sm:$0xff]  }
 0x1a2   :  { %7152 = vmatpush3.bf16.msra.mxu1 %v7774_v28  ;;  %v7812_v28 = vld [vmem:[%s9702_s2 + $0xe48] sm:$0xff]  }
 0x1a3   :  { %5601 = vmatmul.mubr.bf16.vlgmr.msra.gmra.mrb[48].mxu0 %v1397_v30  ;;  %7181 = vmatprep.subr.bf16.mxu1 %v7776_v33  ;;  %v7815_v30 = vld [vmem:[%s9702_s2 + $0xe88] sm:$0xff]   ;;  %v7818_v33 = vld [vmem:[%s9702_s2 + $0xe10] sm:$0xff]  }
 0x1a4   :  { %7160 = vmatpush3.bf16.msra.mxu0 %v7777_v36  ;;  %5680 = vmatprep.mubr.bf16.mxu0 %v1418_v39  ;;  %v7820_v36 = vld [vmem:[%s9702_s2 + $0xe58] sm:$0xff]  }
 0x1a5   :  { %5641 = vmatmul.mubr.bf16.vlgmr.msra.gmra.mrb[48].mxu1 %v1419_v40  ;;  %7161 = vmatprep.subr.bf16.mxu0 %v7779_v41  ;;  %v7823_v39 = vld [vmem:[%s9702_s2 + $0xe98] sm:$0xff]   ;;  %v7824_v40 = vld [vmem:[%s9702_s2 + $0xe60] sm:$0xff]  }
 0x1a6   :  { %7182 = vmatpush3.bf16.msra.mxu1 %v7778_v38  ;;  %5720 = vmatprep.mubr.bf16.mxu1 %v1422_v44  ;;  %v7822_v38 = vld [vmem:[%s9702_s2 + $0xe18] sm:$0xff]   ;;  %v7825_v41 = vld [vmem:[%s9702_s2 + $0xee0] sm:$0xff]  }
 0x1a7   :  { %7183 = vmatprep.subr.bf16.mxu1 %v7780_v43  ;;  %v7826_v43 = vld [vmem:[%s9702_s2 + $0xe20] sm:$0xff]  }
 0x1a8   :  { %7162 = vmatpush3.bf16.msra.mxu0 %v7781_v45  ;;  %v7827_v44 = vld [vmem:[%s9702_s2 + $0xea0] sm:$0xff]   ;;  %v7828_v45 = vld [vmem:[%s9702_s2 + $0xe68] sm:$0xff]  }
 0x1a9   :  { %7163 = vmatprep.subr.bf16.mxu0 %v7783_v47  ;;  %v7830_v47 = vld [vmem:[%s9702_s2 + $0xe28] sm:$0xff]  }
 0x1aa   :  { %7184 = vmatpush3.bf16.msra.mxu1 %v7782_v46  ;;  %v7829_v46 = vld [vmem:[%s9702_s2 + $0xee8] sm:$0xff]  }
 0x1ab   :  { %7185 = vmatprep.subr.bf16.mxu1 %v7784_v48  ;;  %v7831_v48 = vld [vmem:[%s9702_s2 + $0xea8] sm:$0xff]  }
 0x1ac   :  { %7164 = vmatpush3.bf16.msra.mxu0 %v7785_v49  ;;  %v7832_v49 = vld [vmem:[%s9702_s2 + $0xe70] sm:$0xff]  }
 0x1ad   :  { %7165 = vmatprep.subr.bf16.mxu0 %v7787_v51  ;;  %v7833_v51 = vld [vmem:[%s9702_s2 + $0xef0] sm:$0xff]  }
 0x1ae   :  { %7186 = vmatpush3.bf16.msra.mxu1 %v7786_v50 }
 0x1af   :  { %7187 = vmatprep.subr.bf16.mxu1 %v7788_v52 }
 0x1b0   :  { %7166 = vmatpush3.bf16.msra.mxu0 %v7789_v53  ;;  %v7834_v53 = vld [vmem:[%s9702_s2 + $0xe30] sm:$0xff]  }
 0x1b1   :  { %7167 = vmatprep.subr.bf16.mxu0 %v7791_v55 }
 0x1b2   :  { %7188 = vmatpush3.bf16.msra.mxu1 %v7790_v54 }
 0x1b3   :  { %7189 = vmatprep.subr.bf16.mxu1 %v7792_v56 }
 0x1b4   :  { %7168 = vmatpush3.bf16.msra.mxu0 %v7793_v57 }
 0x1b5   :  { %7169 = vmatprep.subr.bf16.mxu0 %v7795_v59  ;;  %v7835_v59 = vld [vmem:[%s9702_s2 + $0xeb0] sm:$0xff]  }
 0x1b6   :  { %7190 = vmatpush3.bf16.msra.mxu1 %v7794_v58  ;;  %v6867_v0 = vpop.f32.mrb[24].mxu0 }
 0x1b7   :  { %v6868_v2 = vpop.f32.mrb[25].mxu0  ;;  %7191 = vmatprep.subr.bf16.mxu1 %v7796_v60  ;;  %v7836_v60 = vld [vmem:[%s9702_s2 + $0xe78] sm:$0xff]  }
 0x1b8   :  { %v6889_v4 = vpop.f32.mrb[24].mxu1  ;;  %v6869_v5 = vadd.f32 %v6868_v2, %v6867_v0  ;;  %v6870_v6 = vpop.f32.mrb[26].mxu0  ;;  %7170 = vmatpush3.bf16.msra.mxu0 %v7797_v61  ;;  %v35_v0 = vld [vmem:[%s9700_s0 + $0x38] sm:$0xff] }
 0x1b9   :  { %v6890_v9 = vpop.f32.mrb[25].mxu1  ;;  %v6871_v10 = vpop.f32.mrb[27].mxu0  ;;  %7171 = vmatprep.subr.bf16.mxu0 %v7799_v63  ;;  %v7837_v2 = vld [vmem:[%s9702_s2 + $0xef8] sm:$0xff]  }
 0x1ba   :  { %v5123_v11 = vadd.f32 %v6869_v5, %v9312_v27  ;;  %v6891_v12 = vadd.f32 %v6890_v9, %v6889_v4  ;;  %v6892_v13 = vpop.f32.mrb[26].mxu1  ;;  %7192 = vmatpush3.bf16.msra.mxu1 %v7798_v62  ;;  %v1420_v27 = vcombine.high %v1404_v19, %v1404_v19  ;;  %v1423_v4 = vcombine.high %v35_v0, %v35_v0  ;;  %v7838_v6 = vld [vmem:[%s9702_s2 + $0xe38] sm:$0xff]   ;;  %v7840_v9 = vld [vmem:[%s9702_s2 + $0xf40] sm:$0xff]  }
 0x1bb   :  { %v6893_v15 = vpop.f32.mrb[27].mxu1  ;;  %7193 = vmatprep.subr.bf16.mxu1 %v7800_v1 }
 0x1bc   :  { %v9419_v17 = vadd.f32 %v6891_v12, %v5123_v11  ;;  %7172 = vmatpush3.bf16.msra.mxu0 %v7801_v3  ;;  %v1430_v3 = vrot.slane %v35_v0, %v8060_v42  ;;  %v9537_v10 = vrot.slane %v1423_v4, %v8060_v42  ;;  %v7902_v11 = vmov 3   ;;  %v7839_v12 = vld [vmem:[%s9702_s2 + $0xeb8] sm:$0xff]  }
 0x1bd   :  { %7173 = vmatprep.subr.bf16.mxu0 %v7803_v8  ;;  %7347 = vset.pattern.permute.xlu1 %v7902_v11 }
 0x1be   :  { %7194 = vmatpush3.bf16.msra.mxu1 %v7802_v7  ;;  %v1438_v7 = vcombine.high %v1430_v3, %v1430_v3  ;;  %v1446_v8 = vrot.slane %v1430_v3, %v8060_v42  ;;  %5909 = vperm.xlu1 %7347, %v9435_v23   ;;  %v1439_v15 = vcombine.high %v9537_v10, %v9537_v10 }
 0x1bf   :  { %7195 = vmatprep.subr.bf16.mxu1 %v7804_v14  ;;  %v7841_v14 = vld [vmem:[%s9702_s2 + $0xfc0] sm:$0xff]  }
 0x1c0   :  { %7174 = vmatpush3.bf16.msra.mxu0 %v7805_v16  ;;  %v1460_v13 = vrot.slane %v1438_v7, %v8060_v42  ;;  %v7842_v16 = vld [vmem:[%s9702_s2 + $0xf00] sm:$0xff]   ;;  %v1467_v21 = vrot.slane %v1439_v15, %v8060_v42 }
 0x1c1   :  { %7203 = vmatprep.subr.bf16.mxu0 %v7808_v20  ;;  %v7844_v20 = vld [vmem:[%s9702_s2 + $0xf48] sm:$0xff]  }
 0x1c2   :  { %7196 = vmatpush3.bf16.msra.mxu1 %v7806_v18  ;;  %v1470_v18 = vcombine.high %v1460_v13, %v1460_v13 }
 0x1c3   :  { %5681 = vmatmul.mubr.bf16.vlgmr.msra.gmra.mrb[52].mxu0 %v1404_v19  ;;  %7225 = vmatprep.subr.bf16.mxu1 %v7809_v22  ;;  %v1468_v19 = vcombine.high %v1446_v8, %v1446_v8  ;;  %v7843_v22 = vld [vmem:[%s9702_s2 + $0xf80] sm:$0xff]  }
 0x1c4   :  { %7204 = vmatpush3.bf16.msra.mxu0 %v7810_v25  ;;  %5760 = vmatprep.mubr.bf16.mxu0 %v1460_v13  ;;  %v7845_v25 = vld [vmem:[%s9702_s2 + $0xfc8] sm:$0xff]  }
 0x1c5   :  { %5721 = vmatmul.mubr.bf16.vlgmr.msra.gmra.mrb[52].mxu1 %v1420_v27  ;;  %7205 = vmatprep.subr.bf16.mxu0 %v7812_v28  ;;  %v7846_v27 = vld [vmem:[%s9702_s2 + $0xf08] sm:$0xff]   ;;  %v7848_v28 = vld [vmem:[%s9702_s2 + $0xf50] sm:$0xff]  }
 0x1c6   :  { %7226 = vmatpush3.bf16.msra.mxu1 %v7811_v26  ;;  %5800 = vmatprep.mubr.bf16.mxu1 %v1470_v18  ;;  %v1471_v26 = vcombine.high %v1467_v21, %v1467_v21 }
 0x1c7   :  { %7227 = vmatprep.subr.bf16.mxu1 %v7813_v24  ;;  %v7847_v24 = vld [vmem:[%s9702_s2 + $0xf88] sm:$0xff]  }
 0x1c8   :  { %7206 = vmatpush3.bf16.msra.mxu0 %v7814_v29  ;;  %v7849_v29 = vld [vmem:[%s9702_s2 + $0xfd0] sm:$0xff]  }
 0x1c9   :  { %7207 = vmatprep.subr.bf16.mxu0 %v7816_v31  ;;  %v7904_v31 = vmov 4  }
 0x1ca   :  { %7228 = vmatpush3.bf16.msra.mxu1 %v7815_v30  ;;  %v7850_v30 = vld [vmem:[%s9702_s2 + $0xf10] sm:$0xff]   ;;  %7348 = vset.pattern.permute.xlu1 %v7904_v31 }
 0x1cb   :  { %7229 = vmatprep.subr.bf16.mxu1 %v7817_v32  ;;  %v7852_v32 = vld [vmem:[%s9702_s2 + $0xf58] sm:$0xff]   ;;  %5919 = vperm.xlu1 %7348, %v9435_v23  }
 0x1cc   :  { %7208 = vmatpush3.bf16.msra.mxu0 %v7818_v33  ;;  %v7851_v33 = vld [vmem:[%s9702_s2 + $0xf90] sm:$0xff]  }
 0x1cd   :  { %7209 = vmatprep.subr.bf16.mxu0 %v7820_v36  ;;  %v7853_v36 = vld [vmem:[%s9702_s2 + $0xfd8] sm:$0xff]  }
 0x1ce   :  { %7230 = vmatpush3.bf16.msra.mxu1 %v7819_v35  ;;  %v7905_v35 = vmov 5  }
 0x1cf   :  { %7231 = vmatprep.subr.bf16.mxu1 %v7821_v37  ;;  %v7854_v37 = vld [vmem:[%s9702_s2 + $0xf18] sm:$0xff]  }
 0x1d0   :  { %7210 = vmatpush3.bf16.msra.mxu0 %v7822_v38  ;;  %v7856_v38 = vld [vmem:[%s9702_s2 + $0xf60] sm:$0xff]  }
 0x1d1   :  { %7211 = vmatprep.subr.bf16.mxu0 %v7824_v40  ;;  %v7855_v40 = vld [vmem:[%s9702_s2 + $0xf98] sm:$0xff]  }
 0x1d2   :  { %7232 = vmatpush3.bf16.msra.mxu1 %v7823_v39  ;;  %v7906_v39 = vmov 6  }
 0x1d3   :  { %7233 = vmatprep.subr.bf16.mxu1 %v7825_v41  ;;  %7350 = vset.pattern.permute.xlu1 %v7906_v39  ;;  %v7857_v41 = vld [vmem:[%s9702_s2 + $0xfe0] sm:$0xff]  }
 0x1d4   :  { %7212 = vmatpush3.bf16.msra.mxu0 %v7826_v43  ;;  %5939 = vperm.xlu1 %7350, %v9435_v23   ;;  %v7907_v43 = vmov 7  }
 0x1d5   :  { %7213 = vmatprep.subr.bf16.mxu0 %v7828_v45  ;;  %v7860_v45 = vld [vmem:[%s9702_s2 + $0xf68] sm:$0xff]  }
 0x1d6   :  { %7234 = vmatpush3.bf16.msra.mxu1 %v7827_v44  ;;  %v6911_v50 = vpop.f32.mrb[28].mxu0  ;;  %v7858_v44 = vld [vmem:[%s9702_s2 + $0xf20] sm:$0xff]  }
 0x1d7   :  { %v6912_v52 = vpop.f32.mrb[29].mxu0  ;;  %7235 = vmatprep.subr.bf16.mxu1 %v7829_v46  ;;  %v7859_v46 = vld [vmem:[%s9702_s2 + $0xfa0] sm:$0xff]  }
 0x1d8   :  { %v6933_v54 = vpop.f32.mrb[28].mxu1  ;;  %v6913_v55 = vadd.f32 %v6912_v52, %v6911_v50  ;;  %v6914_v56 = vpop.f32.mrb[30].mxu0  ;;  %7214 = vmatpush3.bf16.msra.mxu0 %v7830_v47  ;;  %7351 = vset.pattern.permute.xlu1 %v7907_v43  ;;  %v7861_v47 = vld [vmem:[%s9702_s2 + $0xfe8] sm:$0xff]  }
 0x1d9   :  { %v6934_v57 = vpop.f32.mrb[29].mxu1  ;;  %v6915_v58 = vpop.f32.mrb[31].mxu0  ;;  %7215 = vmatprep.subr.bf16.mxu0 %v7832_v49  ;;  %5949 = vperm.xlu1 %7351, %v9435_v23   ;;  %v7864_v49 = vld [vmem:[%s9702_s2 + $0xf70] sm:$0xff]  }
 0x1da   :  { %v5203_v61 = vadd.f32 %v6913_v55, %v9419_v17  ;;  %v6935_v62 = vadd.f32 %v6934_v57, %v6933_v54  ;;  %v6936_v63 = vpop.f32.mrb[30].mxu1  ;;  %7236 = vmatpush3.bf16.msra.mxu1 %v7831_v48  ;;  %v7903_v17 = vmov 1   ;;  %v7862_v48 = vld [vmem:[%s9702_s2 + $0xf28] sm:$0xff]   ;;  %v7866_v56 = vld [vmem:[%s9702_s2 + $0xf30] sm:$0xff]   ;;  %v7868_v57 = vld [vmem:[%s9702_s2 + $0xf78] sm:$0xff]  }
 0x1db   :  { %v6937_v1 = vpop.f32.mrb[31].mxu1  ;;  %7237 = vmatprep.subr.bf16.mxu1 %v7833_v51  ;;  %7345 = vset.pattern.permute.xlu0 %v7903_v17  ;;  %v7863_v51 = vld [vmem:[%s9702_s2 + $0xfa8] sm:$0xff]   ;;  %v7867_v63 = vld [vmem:[%s9702_s2 + $0xfb0] sm:$0xff]  }
 0x1dc   :  { %v9527_v5 = vadd.f32 %v6935_v62, %v5203_v61  ;;  %7216 = vmatpush3.bf16.msra.mxu0 %v7834_v53  ;;  %5889 = vperm.xlu0 %7345, %v9435_v23   ;;  %v7869_v1 = vld [vmem:[%s9702_s2 + $0xff8] sm:$0xff]  }
 0x1dd   :  { %7217 = vmatprep.subr.bf16.mxu0 %v7836_v60 }
 0x1de   :  { %7238 = vmatpush3.bf16.msra.mxu1 %v7835_v59 }
 0x1df   :  { %7239 = vmatprep.subr.bf16.mxu1 %v7837_v2 }
 0x1e0   :  { %7218 = vmatpush3.bf16.msra.mxu0 %v7838_v6  ;;  %7349 = vset.pattern.permute.xlu0 %v7905_v35 }
 0x1e1   :  { %7247 = vmatprep.subr.bf16.mxu0 %v7840_v9  ;;  %5929 = vperm.xlu0 %7349, %v9435_v23   ;;  %v7865_v23 = vld [vmem:[%s9702_s2 + $0xff0] sm:$0xff]  }
 0x1e2   :  { %7240 = vmatpush3.bf16.msra.mxu1 %v7839_v12 }
 0x1e3   :  { %5761 = vmatmul.mubr.bf16.vlgmr.msra.gmra.mrb[56].mxu0 %v1446_v8  ;;  %7269 = vmatprep.subr.bf16.mxu1 %v7841_v14 }
 0x1e4   :  { %7248 = vmatpush3.bf16.msra.mxu0 %v7842_v16  ;;  %5840 = vmatprep.mubr.bf16.mxu0 %v1467_v21 }
 0x1e5   :  { %5801 = vmatmul.mubr.bf16.vlgmr.msra.gmra.mrb[56].mxu1 %v1468_v19  ;;  %7249 = vmatprep.subr.bf16.mxu0 %v7844_v20 }
 0x1e6   :  { %7270 = vmatpush3.bf16.msra.mxu1 %v7843_v22  ;;  %5880 = vmatprep.mubr.bf16.mxu1 %v1471_v26 }
 0x1e7   :  { %7271 = vmatprep.subr.bf16.mxu1 %v7845_v25  ;;  %7352 = vset.pattern.permute.xlu0 %v7907_v43 }
 0x1e8   :  { %7250 = vmatpush3.bf16.msra.mxu0 %v7846_v27 }
 0x1e9   :  { %7251 = vmatprep.subr.bf16.mxu0 %v7848_v28 }
 0x1ea   :  { %7272 = vmatpush3.bf16.msra.mxu1 %v7847_v24 }
 0x1eb   :  { %7273 = vmatprep.subr.bf16.mxu1 %v7849_v29 }
 0x1ec   :  { %7252 = vmatpush3.bf16.msra.mxu0 %v7850_v30 }
 0x1ed   :  { %7253 = vmatprep.subr.bf16.mxu0 %v7852_v32 }
 0x1ee   :  { %7274 = vmatpush3.bf16.msra.mxu1 %v7851_v33 }
 0x1ef   :  { %7275 = vmatprep.subr.bf16.mxu1 %v7853_v36 }
 0x1f0   :  { %7254 = vmatpush3.bf16.msra.mxu0 %v7854_v37 }
 0x1f1   :  { %7255 = vmatprep.subr.bf16.mxu0 %v7856_v38 }
 0x1f2   :  { %7276 = vmatpush3.bf16.msra.mxu1 %v7855_v40 }
 0x1f3   :  { %7277 = vmatprep.subr.bf16.mxu1 %v7857_v41 }
 0x1f4   :  { %7256 = vmatpush3.bf16.msra.mxu0 %v7858_v44 }
 0x1f5   :  { %7257 = vmatprep.subr.bf16.mxu0 %v7860_v45 }
 0x1f6   :  { %7278 = vmatpush3.bf16.msra.mxu1 %v7859_v46  ;;  %v6955_v50 = vpop.f32.mrb[32].mxu0 }
 0x1f7   :  { %v6956_v52 = vpop.f32.mrb[33].mxu0  ;;  %7279 = vmatprep.subr.bf16.mxu1 %v7861_v47 }
 0x1f8   :  { %v6977_v53 = vpop.f32.mrb[32].mxu1  ;;  %v6957_v54 = vadd.f32 %v6956_v52, %v6955_v50  ;;  %v6958_v55 = vpop.f32.mrb[34].mxu0  ;;  %7258 = vmatpush3.bf16.msra.mxu0 %v7862_v48 }
 0x1f9   :  { %v6978_v58 = vpop.f32.mrb[33].mxu1  ;;  %v6959_v59 = vpop.f32.mrb[35].mxu0  ;;  %7259 = vmatprep.subr.bf16.mxu0 %v7864_v49 }
 0x1fa   :  { %v5283_v60 = vadd.f32 %v6957_v54, %v9527_v5  ;;  %v6979_v61 = vadd.f32 %v6978_v58, %v6977_v53  ;;  %v6980_v62 = vpop.f32.mrb[34].mxu1  ;;  %7280 = vmatpush3.bf16.msra.mxu1 %v7863_v51 }
 0x1fb   :  { %v6981_v0 = vpop.f32.mrb[35].mxu1  ;;  %7281 = vmatprep.subr.bf16.mxu1 %v7865_v23 }
 0x1fc   :  { %12 = vsyncpa [#allocation3], 0  ;;  %v5323_v2 = vadd.f32 %v6979_v61, %v5283_v60  ;;  %7260 = vmatpush3.bf16.msra.mxu0 %v7866_v56  ;;  %v7870_v3 = vld [vmem:[%s9702_s2 + $0xf38] sm:$0xff]   ;;  %v1453_v4 = vrot.slane %v9537_v10, %v8060_v42  ;;  %v5967_v45 = vld [vmem:[%s9705_s5] sm:$0xff]  ;;  %v7908_v48 = vmov 0.0|0.0   ;;  %vm7909_vm0 = vmmov 0  }
 0x1fd   :  { %7261 = vmatprep.subr.bf16.mxu0 %v7868_v57  ;;  %v7871_v5 = vld [vmem:[%s9702_s2 + $0xfb8] sm:$0xff]   ;;  %v5968_v46 = vld [vmem:[%s9705_s5 + $0x8] sm:$0xff]  ;;  %v5969_v49 = vld [vmem:[%s9705_s5 + $0x10] sm:$0xff]  ;;  %v7910_v57 = vmov 0.0   ;;  %vm5982_vm1 = vcmask 523264   ;;  %s7911_s21 = smov [#allocation2]  }
 0x1fe   :  { %7282 = vmatpush3.bf16.msra.mxu1 %v7867_v63  ;;  %v1469_v6 = vcombine.high %v1453_v4, %v1453_v4  ;;  %v7320_v47 = vpack.c.bf16 %v5968_v46, %v5967_v45  ;;  %v5970_v50 = vld [vmem:[%s9705_s5 + $0x18] sm:$0xff]  ;;  %v5971_v52 = vld [vmem:[%s9705_s5 + $0x20] sm:$0xff]  ;;  %v5972_v23 = vld [vmem:[%s9705_s5 + $0x28] sm:$0xff]  ;;  %s6064_s22 = sshll.u32 %s7911_s21, 4  ;;  %vm6056_vm2 = vcmask 123904   ;;  %s6065_s22 = int_to_ptr.vmem [resolvable:$true] %s6064_s22 }
 0x1ff   :  { %7283 = vmatprep.subr.bf16.mxu1 %v7869_v1  ;;  %v7323_v51 = vpack.c.bf16 %v5970_v50, %v5969_v49  ;;  %v7326_v53 = vpack.c.bf16 %v5972_v23, %v5971_v52  ;;  %v5973_v54 = vld [vmem:[%s9705_s5 + $0x30] sm:$0xff]  ;;  %v5974_v55 = vld [vmem:[%s9705_s5 + $0x38] sm:$0xff]  ;;  %v5924_v49 = vsub.s32 4, %v8048_v34  ;;  %s7875_s23 = scalar_lea.vmem %s6065_s22, 32  ;;  %p7880_p1 = scmp.lt.s32.totalorder %s6065_s22, %s6065_s22 }
 0x200   :  { %7262 = vmatpush3.bf16.msra.mxu0 %v7870_v3  ;;  %v7329_v56 = vpack.c.bf16 %v5974_v55, %v5973_v54  ;;  %p7876_p0 = scmp.ne.s32.totalorder %s6065_s22, %s7875_s23  ;;  %p7881_p2 = scmp.lt.s32.totalorder %s7875_s23, %s7875_s23 }
 0x201   :  { %7319 = vmatprep.subr.bf16.mxu0 %v7908_v48 }
 0x202   :  { %7284 = vmatpush3.bf16.msra.mxu1 %v7871_v5  ;;  %p7882_p3 = por %p7881_p2, %p7880_p1 }
 0x203   :  { %5841 = vmatmul.mubr.bf16.vlgmr.msra.gmra.mrb[60].mxu0 %v1453_v4 }
 0x204   :  { %7321 = vmatpush3.bf16.msra.mxu0 %v7320_v47  ;;  %7316 = vmatprep.mubr.msk.f32.mxu0 %vm7909_vm0, %v7910_v57  ;;  %p7883_p4 = pnand %p7882_p3, %p7876_p0 }
 0x205   :  { %5881 = vmatmul.mubr.bf16.vlgmr.msra.gmra.mrb[60].mxu1 %v1469_v6  ;;  %7322 = vmatprep.subr.bf16.mxu0 %v7908_v48 }
 0x208   :  { %7324 = vmatpush3.bf16.msra.mxu0 %v7323_v51 }
 0x209   :  { %7325 = vmatprep.subr.bf16.mxu0 %v7908_v48 }
 0x20c   :  { %7327 = vmatpush3.bf16.msra.mxu0 %v7326_v53  ;;  %v5934_v53 = vsub.s32 5, %v8048_v34 }
 0x20d   :  { %7328 = vmatprep.subr.bf16.mxu0 %v7908_v48 }
 0x210   :  { %7330 = vmatpush3.bf16.msra.mxu0 %v7329_v56 }
 0x216   :  { %v6999_v7 = vpop.f32.mrb[36].mxu0 }
 0x217   :  { %v7000_v8 = vpop.f32.mrb[37].mxu0 }
 0x218   :  { %v7021_v9 = vpop.f32.mrb[36].mxu1  ;;  %v7001_v11 = vadd.f32 %v7000_v8, %v6999_v7  ;;  %v7002_v12 = vpop.f32.mrb[38].mxu0 }
 0x219   :  { %v7022_v13 = vpop.f32.mrb[37].mxu1  ;;  %v7003_v14 = vpop.f32.mrb[39].mxu0 }
 0x21a   :  { %v5363_v15 = vadd.f32 %v7001_v11, %v5323_v2  ;;  %v7023_v42 = vadd.f32 %v7022_v13, %v7021_v9  ;;  %v7024_v10 = vpop.f32.mrb[38].mxu1 }
 0x21b   :  { %v7025_v16 = vpop.f32.mrb[39].mxu1 }
 0x21c   :  { %v5403_v17 = vadd.f32 %v7023_v42, %v5363_v15 }
 0x236   :  { %v7043_v18 = vpop.f32.mrb[40].mxu0 }
 0x237   :  { %v7044_v19 = vpop.f32.mrb[41].mxu0 }
 0x238   :  { %v7065_v20 = vpop.f32.mrb[40].mxu1  ;;  %v7045_v21 = vadd.f32 %v7044_v19, %v7043_v18  ;;  %v7046_v22 = vpop.f32.mrb[42].mxu0 }
 0x239   :  { %v7066_v25 = vpop.f32.mrb[41].mxu1  ;;  %v7047_v26 = vpop.f32.mrb[43].mxu0 }
 0x23a   :  { %v5443_v27 = vadd.f32 %v7045_v21, %v5403_v17  ;;  %v7067_v28 = vadd.f32 %v7066_v25, %v7065_v20  ;;  %v7068_v24 = vpop.f32.mrb[42].mxu1 }
 0x23b   :  { %v7069_v29 = vpop.f32.mrb[43].mxu1 }
 0x23c   :  { %v5483_v30 = vadd.f32 %v7067_v28, %v5443_v27 }
 0x256   :  { %v7087_v31 = vpop.f32.mrb[44].mxu0 }
 0x257   :  { %v7088_v32 = vpop.f32.mrb[45].mxu0 }
 0x258   :  { %v7109_v33 = vpop.f32.mrb[44].mxu1  ;;  %v7089_v35 = vadd.f32 %v7088_v32, %v7087_v31  ;;  %v7090_v36 = vpop.f32.mrb[46].mxu0  ;;  %v5894_v32 = vsub.s32 1, %v8048_v34 }
 0x259   :  { %v7110_v37 = vpop.f32.mrb[45].mxu1  ;;  %v7091_v38 = vpop.f32.mrb[47].mxu0  ;;  %v7874_v36 = vld [vmem:[%s9703_s3] sm:$0xff] }
 0x25a   :  { %v5523_v39 = vadd.f32 %v7089_v35, %v5483_v30  ;;  %v7111_v40 = vadd.f32 %v7110_v37, %v7109_v33  ;;  %v7112_v41 = vpop.f32.mrb[46].mxu1  ;;  %v5900_v30 = vpop.permute.xlu1 %5899  ;;  %v5904_v33 = vsub.s32 2, %v8048_v34  ;;  %v5895_v37 = vrot.slane %v7874_v36, %v5894_v32 }
 0x25b   :  { %v7113_v43 = vpop.f32.mrb[47].mxu1  ;;  %v5890_v38 = vpop.permute.xlu0 %5889 }
 0x25c   :  { %v5563_v44 = vadd.f32 %v7111_v40, %v5523_v39  ;;  %v5905_v46 = vrot.slane %v7874_v36, %v5904_v33  ;;  %v5896_v23 = vmul.f32 %v5895_v37, %v5890_v38 }
 0x25e   :  { %v5910_v31 = vpop.permute.xlu1 %5909  ;;  %v5906_v57 = vmul.f32 %v5905_v46, %v5900_v30 }
 0x262   :  { %v5920_v40 = vpop.permute.xlu1 %5919 }
 0x276   :  { %v7131_v58 = vpop.f32.mrb[48].mxu0 }
 0x277   :  { %v7132_v59 = vpop.f32.mrb[49].mxu0 }
 0x278   :  { %v7153_v60 = vpop.f32.mrb[48].mxu1  ;;  %v7133_v61 = vadd.f32 %v7132_v59, %v7131_v58  ;;  %v7134_v62 = vpop.f32.mrb[50].mxu0  ;;  %v5944_v58 = vsub.s32 6, %v8048_v34 }
 0x279   :  { %v7154_v63 = vpop.f32.mrb[49].mxu1  ;;  %v7135_v0 = vpop.f32.mrb[51].mxu0  ;;  %v5935_v62 = vrot.slane %v7874_v36, %v5934_v53 }
 0x27a   :  { %v5603_v1 = vadd.f32 %v7133_v61, %v5563_v44  ;;  %v7155_v2 = vadd.f32 %v7154_v63, %v7153_v60  ;;  %v7156_v3 = vpop.f32.mrb[50].mxu1  ;;  %v5914_v44 = vsub.s32 3, %v8048_v34  ;;  %v5940_v59 = vpop.permute.xlu1 %5939  ;;  %v5925_v61 = vrot.slane %v7874_v36, %v5924_v49 }
 0x27b   :  { %v7157_v4 = vpop.f32.mrb[51].mxu1  ;;  %v5954_v63 = vsub.s32 7, %v8048_v34  ;;  %v5930_v0 = vpop.permute.xlu0 %5929  ;;  %v5945_v3 = vrot.slane %v7874_v36, %v5944_v58 }
 0x27c   :  { %v5643_v5 = vadd.f32 %v7155_v2, %v5603_v1  ;;  %v5915_v56 = vrot.slane %v7874_v36, %v5914_v44 }
 0x27e   :  { %v5916_v1 = vmul.f32 %v5915_v56, %v5910_v31 }
 0x296   :  { %v7175_v6 = vpop.f32.mrb[52].mxu0 }
 0x297   :  { %v7176_v7 = vpop.f32.mrb[53].mxu0 }
 0x298   :  { %v7197_v8 = vpop.f32.mrb[52].mxu1  ;;  %v7177_v9 = vadd.f32 %v7176_v7, %v7175_v6  ;;  %v7178_v11 = vpop.f32.mrb[54].mxu0  ;;  %v5936_v6 = vmul.f32 %v5935_v62, %v5930_v0  ;;  %v5955_v7 = vrot.slane %v7874_v36, %v5954_v63 }
 0x299   :  { %v7198_v12 = vpop.f32.mrb[53].mxu1  ;;  %v7179_v13 = vpop.f32.mrb[55].mxu0  ;;  %v5946_v11 = vmul.f32 %v5945_v3, %v5940_v59 }
 0x29a   :  { %v5683_v14 = vadd.f32 %v7177_v9, %v5643_v5  ;;  %v7199_v15 = vadd.f32 %v7198_v12, %v7197_v8  ;;  %v7200_v42 = vpop.f32.mrb[54].mxu1  ;;  %v5926_v5 = vmul.f32 %v5925_v61, %v5920_v40  ;;  %v5950_v8 = vpop.permute.xlu1 %5949 }
 0x29b   :  { %v7201_v10 = vpop.f32.mrb[55].mxu1  ;;  %v5956_v13 = vmul.f32 %v5955_v7, %v5950_v8 }
 0x29c   :  { %v5723_v16 = vadd.f32 %v7199_v15, %v5683_v14  ;;  %v6584_v15 = vld [vmem:[%s9704_s4] ss:$0 sm:$0xff] }
 0x2b6   :  { %v7219_v17 = vpop.f32.mrb[56].mxu0 }
 0x2b7   :  { %v7220_v18 = vpop.f32.mrb[57].mxu0 }
 0x2b8   :  { %v7241_v19 = vpop.f32.mrb[56].mxu1  ;;  %v7221_v20 = vadd.f32 %v7220_v18, %v7219_v17  ;;  %v7222_v21 = vpop.f32.mrb[58].mxu0 }
 0x2b9   :  { %v7242_v22 = vpop.f32.mrb[57].mxu1  ;;  %v7223_v25 = vpop.f32.mrb[59].mxu0 }
 0x2ba   :  { %v5763_v26 = vadd.f32 %v7221_v20, %v5723_v16  ;;  %v7243_v27 = vadd.f32 %v7242_v22, %v7241_v19  ;;  %v7244_v28 = vpop.f32.mrb[58].mxu1  ;;  %v6585_v16 = vld [vmem:[%s9706_s6] ss:$0 sm:$0xff] }
 0x2bb   :  { %v7245_v24 = vpop.f32.mrb[59].mxu1 }
 0x2bc   :  { %v5803_v29 = vadd.f32 %v7243_v27, %v5763_v26 }
 0x2d6   :  { %v7263_v35 = vpop.f32.mrb[60].mxu0 }
 0x2d7   :  { %v7264_v39 = vpop.f32.mrb[61].mxu0 }
 0x2d8   :  { %v7285_v41 = vpop.f32.mrb[60].mxu1  ;;  %v7265_v43 = vadd.f32 %v7264_v39, %v7263_v35  ;;  %v7266_v45 = vpop.f32.mrb[62].mxu0 }
 0x2d9   :  { %v7286_v47 = vpop.f32.mrb[61].mxu1  ;;  %v7267_v48 = vpop.f32.mrb[63].mxu0 }
 0x2da   :  { %v5843_v50 = vadd.f32 %v7265_v43, %v5803_v29  ;;  %v7287_v51 = vadd.f32 %v7286_v47, %v7285_v41  ;;  %v7288_v52 = vpop.f32.mrb[62].mxu1 }
 0x2db   :  { %v7289_v54 = vpop.f32.mrb[63].mxu1 }
 0x2dc   :  { %v5883_v55 = vadd.f32 %v7287_v51, %v5843_v50 }
 0x2de   :  { %v5897_v60 = vadd.f32 %v5896_v23, %v5883_v55 }
 0x2e0   :  { %v5907_v2 = vadd.f32 %v5906_v57, %v5897_v60 }
 0x2e2   :  { %v5917_v4 = vadd.f32 %v5916_v1, %v5907_v2 }
 0x2e4   :  { %v5927_v9 = vadd.f32 %v5926_v5, %v5917_v4 }
 0x2e6   :  { %v5937_v12 = vadd.f32 %v5936_v6, %v5927_v9 }
 0x2e8   :  { %v5947_v14 = vadd.f32 %v5946_v11, %v5937_v12 }
 0x2ea   :  { %v5957_v42 = vadd.f32 %v5956_v13, %v5947_v14 }
 0x2ec   :  { %v5965_v34 = vadd.f32 %v6584_v15, %v5957_v42 }
 0x2ee   :  { %v5966_v10 = vmax.f32 %v5965_v34, 0.0 }
 0x2f0   :  { %7317 = vmatmul.mubr.msk.f32.vlgmr.msra.gmra.mrb[64].mxu0 %vm5982_vm1, %v5966_v10 }
 0x3c3   :  { %v6052_v17 = vpop.f32.mrb[64].mxu0 }
 0x3c4   :  { %v6053_v18 = vadd.f32 %v6585_v16, %v6052_v17  ;;  %v7318_v19 = vpop.f32.mrb[65].mxu0 }
 0x3c6   :  { %6057 = vst.msk [vmem:[#allocation2] sm:$0x3] %vm6056_vm2, %v6053_v18 }
 0x3c7   :  { %7886 = shalt.err (!%p7883_p4)
}
 0x3c8   :  { %s7887_s25 = scalar_lea.hbm %s9707_s7, 32 }
 0x3c9   :  { %p7888_p5 = scmp.ne.s32.totalorder %s9707_s7, %s7887_s25  ;;  %p7891_p6 = scmp.lt.u32.totalorder %s7887_s25, %s9707_s7 }
 0x3cb   :  { %p7893_p7 = pnand %p7891_p6, %p7888_p5 }
 0x3cd   :  { %7896 = shalt.err (!%p7893_p7)
}
 0x3ce   :  { %6067 = dma.vmem_to_hbm [thread:$0]  %s6065_s22, 32, %s9707_s7, [#allocation3]  }
 0x3cf   :  { %7897 = dma.done.wait [#allocation3], 32  }
 0x3d0   :  { %7898 = vsyncadd [#allocation3], 4294967264 }
 0x3d1   :  { %6071 = vsyncpa [#allocation3], 1 }

</bundles_post_ra>
